<compile_context>
chip_gen: v7x
topology: tpu7x:2x2x1
jax: 0.10.0
libtpu: 0.0.40
codegen_flags: <defaults>
</compile_context>

<pallas_src>
import jax
import jax.numpy as jnp
from jax.experimental import pallas as pl
from jax.experimental.pallas import tpu as pltpu


HEAD_DIM = 102            # logical head output width
HEAD_PAD = 128            # padded per-head width (lane multiple)
SLAB_W = 256              # lane width of every weight chunk / layer output
CAT_PAD = 2 * HEAD_PAD    # 256, padded concat width (== SLAB_W)
IN_FEATURES = 3 * 16 * 16  # 768

# Weight-slab row offsets (every chunk is SLAB_W = 256 lanes wide, bf16).
ROW_HEAD = 0                      # merged heads:            (768, 256)
ROW_L1 = ROW_HEAD + IN_FEATURES   # Layer1, 4 column chunks: (4*256, 256)
ROW_L2 = ROW_L1 + 1024            # Layer2:                  (1024, 256)
ROW_L3 = ROW_L2 + 1024            # Layer3, 2 column chunks: (2*256, 256)
ROW_L4 = ROW_L3 + 512             # Layer4 (128 -> 256 pad): (512, 256)
ROW_L5 = ROW_L4 + 512             # Layer5 (padded both):    (256, 256)
W_SLAB_ROWS = ROW_L5 + 256        # 4096 rows, ~2 MiB bf16

# Bias-slab column offsets (single (1, 2560) f32 row; all lane-aligned).
COL_HEAD = 0
COL_L1 = COL_HEAD + 256
COL_L2 = COL_L1 + 1024
COL_L3 = COL_L2 + 256
COL_L4 = COL_L3 + 512
COL_L5 = COL_L4 + 256
B_SLAB_COLS = COL_L5 + 256        # 2560


def _round_up(n, m):
    return ((n + m - 1) // m) * m


# ---------------------------------------------------------------------------
# Kernel
# ---------------------------------------------------------------------------
def _mlp_kernel(x_ref, w_ref, b_ref, o_ref):
    x = x_ref[...]                              # (tile_m, 768) bf16

    def w_at(row, k):                           # static slice -> (k, 256) bf16
        return w_ref[row:row + k, :]

    def b_at(col, n):                           # static slice -> (1, n) f32
        return b_ref[:, col:col + n]

    def layer(h, row, k, n_chunks, bcol, relu):
        # Wide layers are stored as `n_chunks` lane-aligned column chunks of
        # the weight slab, stacked along rows; concat at 256-lane boundaries
        # is a cheap vreg placement.
        parts = [
            jnp.dot(h, w_at(row + j * k, k), preferred_element_type=jnp.float32)
            for j in range(n_chunks)
        ]
        acc = parts[0] if n_chunks == 1 else jnp.concatenate(parts, axis=1)
        acc = acc + b_at(bcol, n_chunks * SLAB_W)
        return jnp.maximum(acc, 0.0) if relu else acc

    # Merged Model1/Model2 + concat (no ReLU).  Intermediates are cast to
    # bf16 right away: halves spill traffic and is exactly the operand dtype
    # the next MXU dot needs.
    h = layer(x, ROW_HEAD, IN_FEATURES, 1, COL_HEAD, relu=False).astype(jnp.bfloat16)
    h = layer(h, ROW_L1, SLAB_W, 4, COL_L1, relu=True).astype(jnp.bfloat16)   # Layer1
    h = layer(h, ROW_L2, 1024, 1, COL_L2, relu=True).astype(jnp.bfloat16)     # Layer2
    h = layer(h, ROW_L3, SLAB_W, 2, COL_L3, relu=True).astype(jnp.bfloat16)   # Layer3
    h = layer(h, ROW_L4, 512, 1, COL_L4, relu=True).astype(jnp.bfloat16)      # Layer4
    out = layer(h, ROW_L5, SLAB_W, 1, COL_L5, relu=False)                     # Layer5
    o_ref[...] = out.astype(o_ref.dtype)


# ---------------------------------------------------------------------------
# Parameters
# ---------------------------------------------------------------------------
def _init_linear(key, fan_in, fan_out):
    """PyTorch-style init U(-1/sqrt(fan_in), 1/sqrt(fan_in)); W stored (in, out)."""
    kw, kb = jax.random.split(key)
    bound = 1.0 / jnp.sqrt(jnp.float32(fan_in))
    w = jax.random.uniform(kw, (fan_in, fan_out), jnp.float32, -bound, bound)
    b = jax.random.uniform(kb, (1, fan_out), jnp.float32, -bound, bound)
    return w, b


def make_params(key, in_features=IN_FEATURES):
    keys = jax.random.split(key, 7)
    params = {}
    params["m1"] = _init_linear(keys[0], in_features, HEAD_DIM)  # RGBmodel1 stand-in
    params["m2"] = _init_linear(keys[1], in_features, HEAD_DIM)  # RGBmodel2 stand-in
    params["l1"] = _init_linear(keys[2], HEAD_DIM * 2, 1024)
    params["l2"] = _init_linear(keys[3], 1024, 256)
    params["l3"] = _init_linear(keys[4], 256, 512)
    params["l4"] = _init_linear(keys[5], 512, 128)
    params["l5"] = _init_linear(keys[6], 128, HEAD_DIM)
    return params


def pack_params(params):
    """Merge heads, pad odd dims, and pack everything into one bf16 weight slab
    (W_SLAB_ROWS, 256) plus one f32 bias row (1, B_SLAB_COLS)."""
    f_in = params["m1"][0].shape[0]
    assert f_in == IN_FEATURES, f_in

    wm1, bm1 = params["m1"]
    wm2, bm2 = params["m2"]

    # Merged head matrix: cols [0:102] = head1, [128:230] = head2, rest zero.
    wm = jnp.zeros((f_in, CAT_PAD), jnp.float32)
    wm = wm.at[:, :HEAD_DIM].set(wm1).at[:, HEAD_PAD:HEAD_PAD + HEAD_DIM].set(wm2)
    bm = jnp.zeros((1, CAT_PAD), jnp.float32)
    bm = bm.at[:, :HEAD_DIM].set(bm1).at[:, HEAD_PAD:HEAD_PAD + HEAD_DIM].set(bm2)

    # Layer1 rows remapped to the padded concat layout (zero rows elsewhere).
    w1, b1 = params["l1"]
    w1p = jnp.zeros((CAT_PAD, 1024), jnp.float32)
    w1p = (w1p.at[:HEAD_DIM, :].set(w1[:HEAD_DIM])
               .at[HEAD_PAD:HEAD_PAD + HEAD_DIM, :].set(w1[HEAD_DIM:]))

    w2, b2 = params["l2"]                     # (1024, 256)
    w3, b3 = params["l3"]                     # (256, 512)
    w4, b4 = params["l4"]                     # (512, 128)
    w5, b5 = params["l5"]                     # (128, 102)

    # Layer4: pad output 128 -> 256 lanes (zero cols -> zero activations).
    w4p = jnp.zeros((512, SLAB_W), jnp.float32).at[:, :128].set(w4)
    b4p = jnp.zeros((1, SLAB_W), jnp.float32).at[:, :128].set(b4)
    # Layer5: pad input 128 -> 256 rows (match padded h4) and output 102 -> 256.
    w5p = jnp.zeros((SLAB_W, SLAB_W), jnp.float32).at[:128, :HEAD_DIM].set(w5)
    b5p = jnp.zeros((1, SLAB_W), jnp.float32).at[:, :HEAD_DIM].set(b5)

    def colchunks(w):
        # (K, n*256) -> stack the n column chunks along rows -> (n*K, 256).
        K, N = w.shape
        return jnp.concatenate(
            [w[:, j * SLAB_W:(j + 1) * SLAB_W] for j in range(N // SLAB_W)], axis=0)

    w_slab = jnp.concatenate(
        [wm, colchunks(w1p), w2, colchunks(w3), w4p, w5p], axis=0
    ).astype(jnp.bfloat16)
    b_slab = jnp.concatenate([bm, b1, b2, b3, b4p, b5p], axis=1)

    assert w_slab.shape == (W_SLAB_ROWS, SLAB_W), w_slab.shape
    assert b_slab.shape == (1, B_SLAB_COLS), b_slab.shape
    return w_slab, b_slab


# ---------------------------------------------------------------------------
# Wrapper
# ---------------------------------------------------------------------------
def _pick_tiling(B):
    """Row tiles are multiples of 16 (bf16 sublane packing)."""
    if B <= 16:
        tile_m = _round_up(max(B, 1), 16)               # single tile
    elif B <= 512:
        # Two tiles so the "parallel" batch axis splits across v7x's 2 TCs;
        # up to 256 rows/tile fills the 256-wide MXU on v6e/v7x.
        tile_m = _round_up((B + 1) // 2, 16)
    else:
        # 256-row tiles: full MXU rows on v6e/v7x, two passes on v5e's 128x128.
        tile_m = 256
    b_pad = _round_up(B, tile_m)
    return tile_m, b_pad


@jax.jit
def rgbxrgb_forward(x_nchw, w_slab, b_slab):
    B = x_nchw.shape[0]
    # bf16 activation stream: the only per-tile HBM traffic once weights are
    # VMEM-resident, so halving it moves the kernel off the input-DMA roofline.
    x_flat = x_nchw.reshape(B, -1).astype(jnp.bfloat16)
    f_in = x_flat.shape[1]
    assert f_in == IN_FEATURES, f_in

    tile_m, b_pad = _pick_tiling(B)
    if b_pad != B:
        x_flat = jnp.pad(x_flat, ((0, b_pad - B), (0, 0)))
    grid = (b_pad // tile_m,)

    x_spec = pl.BlockSpec((tile_m, f_in), lambda i: (i, 0))
    out_spec = pl.BlockSpec((tile_m, SLAB_W), lambda i: (i, 0))
    # Constant index_map -> blocks never change; single-buffer them so the
    # ~2 MiB weight slab is not needlessly double-buffered in VMEM.
    w_spec = pl.BlockSpec(w_slab.shape, lambda i: (0, 0),
                          pipeline_mode=pl.Buffered(buffer_count=1))
    b_spec = pl.BlockSpec(b_slab.shape, lambda i: (0, 0),
                          pipeline_mode=pl.Buffered(buffer_count=1))

    per_row_flops = 2 * (IN_FEATURES * SLAB_W + SLAB_W * 1024 + 1024 * SLAB_W
                         + SLAB_W * 512 + 512 * SLAB_W + SLAB_W * SLAB_W)
    bytes_accessed = (W_SLAB_ROWS * SLAB_W * 2 + B_SLAB_COLS * 4
                      + b_pad * f_in * 2 + b_pad * SLAB_W * 4)

    out = pl.pallas_call(
        _mlp_kernel,
        out_shape=jax.ShapeDtypeStruct((b_pad, SLAB_W), jnp.float32),
        grid=grid,
        in_specs=[x_spec, w_spec, b_spec],
        out_specs=out_spec,
        compiler_params=pltpu.CompilerParams(
            dimension_semantics=("parallel",)),
        cost_estimate=pl.CostEstimate(
            flops=per_row_flops * b_pad, transcendentals=0,
            bytes_accessed=bytes_accessed),
    )(x_flat, w_slab, b_slab)

    return out[:B, :HEAD_DIM]


# ---------------------------------------------------------------------------
# Pure-JAX reference (same bf16-weight / bf16-activation / f32-accum recipe).
# ---------------------------------------------------------------------------
def reference_forward(x_nchw, params):
    B = x_nchw.shape[0]
    x = x_nchw.reshape(B, -1).astype(jnp.float32)

    def dense(h, wb, relu=False):
        w, b = wb
        acc = jnp.dot(h.astype(jnp.bfloat16), w.astype(jnp.bfloat16),
                      preferred_element_type=jnp.float32) + b
        return jnp.maximum(acc, 0.0) if relu else acc

    x1 = dense(x, params["m1"])
    x2 = dense(x, params["m2"])
    h = jnp.concatenate([x1, x2], axis=1)
    h = dense(h, params["l1"], relu=True)
    h = dense(h, params["l2"], relu=True)
    h = dense(h, params["l3"], relu=True)
    h = dense(h, params["l4"], relu=True)
    return dense(h, params["l5"])


if __name__ == "__main__":
    key = jax.random.PRNGKey(0)
    k_x, k_p = jax.random.split(key)

    # Small RGB image batch: (B=2, C=3, H=16, W=16), NCHW like PyTorch.
    x = jax.random.normal(k_x, (2, 3, 16, 16), jnp.float32)
    params = make_params(k_p, in_features=3 * 16 * 16)
    w_slab, b_slab = pack_params(params)

    out = rgbxrgb_forward(x, w_slab, b_slab)
    out = jax.block_until_ready(out)

    ref = reference_forward(x, params)
    assert out.shape == (2, HEAD_DIM), out.shape
    max_err = float(jnp.max(jnp.abs(out - ref)))
    assert jnp.allclose(out, ref, atol=1e-2, rtol=1e-2), max_err
    print("KERNEL_OK")
</pallas_src>

<mosaic_0001>
module attributes {stable_mosaic.version = 11 : i64} {
  func.func @_mlp_kernel(%arg0: i32, %arg1: memref<16x768xbf16, #tpu.memory_space<vmem>>, %arg2: memref<4096x256xbf16, #tpu.memory_space<vmem>>, %arg3: memref<1x2560xf32, #tpu.memory_space<vmem>>, %arg4: memref<16x256xf32, #tpu.memory_space<vmem>>) attributes {dimension_semantics = [#tpu.dimension_semantics<parallel>], iteration_bounds = array<i64: 1>, scalar_prefetch = 0 : i64, scratch_operands = 0 : i64, tpu.core_type = #tpu.core_type<tc>, window_params = [{transform_indices = @transform_0, window_bounds = array<i64: 16, 768>}, {pipeline_mode = #tpu.pipeline_mode<synchronous>, transform_indices = @transform_1, window_bounds = array<i64: 4096, 256>}, {pipeline_mode = #tpu.pipeline_mode<synchronous>, transform_indices = @transform_2, window_bounds = array<i64: 1, 2560>}, {transform_indices = @transform_3, window_bounds = array<i64: 16, 256>}]} {
    %c0 = arith.constant 0 : index
    %c0_0 = arith.constant 0 : index
    %0 = vector.load %arg1[%c0, %c0_0] : memref<16x768xbf16, #tpu.memory_space<vmem>>, vector<16x768xbf16>
    %c0_1 = arith.constant 0 : index
    %c0_2 = arith.constant 0 : index
    %1 = vector.load %arg2[%c0_1, %c0_2] : memref<4096x256xbf16, #tpu.memory_space<vmem>>, vector<768x256xbf16>
    %cst = arith.constant dense<0.000000e+00> : vector<16x256xf32>
    %2 = tpu.matmul %0, %1, %cst {dimension_numbers = #tpu.dot_dimension_numbers<[1], [0], [0], [1], [0, 0, 1, 1], [], []>} : vector<16x768xbf16>, vector<768x256xbf16>, vector<16x256xf32> -> vector<16x256xf32>
    %c0_3 = arith.constant 0 : index
    %c0_4 = arith.constant 0 : index
    %3 = vector.load %arg3[%c0_3, %c0_4] : memref<1x2560xf32, #tpu.memory_space<vmem>>, vector<1x256xf32>
    %4 = vector.broadcast %3 : vector<1x256xf32> to vector<16x256xf32>
    %5 = arith.addf %2, %4 : vector<16x256xf32>
    %6 = arith.truncf %5 : vector<16x256xf32> to vector<16x256xbf16>
    %c768 = arith.constant 768 : index
    %c0_5 = arith.constant 0 : index
    %7 = vector.load %arg2[%c768, %c0_5] : memref<4096x256xbf16, #tpu.memory_space<vmem>>, vector<256x256xbf16>
    %cst_6 = arith.constant dense<0.000000e+00> : vector<16x256xf32>
    %8 = tpu.matmul %6, %7, %cst_6 {dimension_numbers = #tpu.dot_dimension_numbers<[1], [0], [0], [1], [0, 0, 1, 1], [], []>} : vector<16x256xbf16>, vector<256x256xbf16>, vector<16x256xf32> -> vector<16x256xf32>
    %c1024 = arith.constant 1024 : index
    %c0_7 = arith.constant 0 : index
    %9 = vector.load %arg2[%c1024, %c0_7] : memref<4096x256xbf16, #tpu.memory_space<vmem>>, vector<256x256xbf16>
    %cst_8 = arith.constant dense<0.000000e+00> : vector<16x256xf32>
    %10 = tpu.matmul %6, %9, %cst_8 {dimension_numbers = #tpu.dot_dimension_numbers<[1], [0], [0], [1], [0, 0, 1, 1], [], []>} : vector<16x256xbf16>, vector<256x256xbf16>, vector<16x256xf32> -> vector<16x256xf32>
    %c1280 = arith.constant 1280 : index
    %c0_9 = arith.constant 0 : index
    %11 = vector.load %arg2[%c1280, %c0_9] : memref<4096x256xbf16, #tpu.memory_space<vmem>>, vector<256x256xbf16>
    %cst_10 = arith.constant dense<0.000000e+00> : vector<16x256xf32>
    %12 = tpu.matmul %6, %11, %cst_10 {dimension_numbers = #tpu.dot_dimension_numbers<[1], [0], [0], [1], [0, 0, 1, 1], [], []>} : vector<16x256xbf16>, vector<256x256xbf16>, vector<16x256xf32> -> vector<16x256xf32>
    %c1536 = arith.constant 1536 : index
    %c0_11 = arith.constant 0 : index
    %13 = vector.load %arg2[%c1536, %c0_11] : memref<4096x256xbf16, #tpu.memory_space<vmem>>, vector<256x256xbf16>
    %cst_12 = arith.constant dense<0.000000e+00> : vector<16x256xf32>
    %14 = tpu.matmul %6, %13, %cst_12 {dimension_numbers = #tpu.dot_dimension_numbers<[1], [0], [0], [1], [0, 0, 1, 1], [], []>} : vector<16x256xbf16>, vector<256x256xbf16>, vector<16x256xf32> -> vector<16x256xf32>
    %15 = tpu.concatenate %8, %10, %12, %14 in 1 : vector<16x256xf32>, vector<16x256xf32>, vector<16x256xf32>, vector<16x256xf32> -> vector<16x1024xf32>
    %c0_13 = arith.constant 0 : index
    %c256 = arith.constant 256 : index
    %16 = vector.load %arg3[%c0_13, %c256] : memref<1x2560xf32, #tpu.memory_space<vmem>>, vector<1x1024xf32>
    %17 = vector.broadcast %16 : vector<1x1024xf32> to vector<16x1024xf32>
    %18 = arith.addf %15, %17 : vector<16x1024xf32>
    %cst_14 = arith.constant 0.000000e+00 : f32
    %19 = vector.broadcast %cst_14 : f32 to vector<16x1024xf32>
    %20 = arith.maximumf %18, %19 : vector<16x1024xf32>
    %21 = arith.truncf %20 : vector<16x1024xf32> to vector<16x1024xbf16>
    %c1792 = arith.constant 1792 : index
    %c0_15 = arith.constant 0 : index
    %22 = vector.load %arg2[%c1792, %c0_15] : memref<4096x256xbf16, #tpu.memory_space<vmem>>, vector<1024x256xbf16>
    %cst_16 = arith.constant dense<0.000000e+00> : vector<16x256xf32>
    %23 = tpu.matmul %21, %22, %cst_16 {dimension_numbers = #tpu.dot_dimension_numbers<[1], [0], [0], [1], [0, 0, 1, 1], [], []>} : vector<16x1024xbf16>, vector<1024x256xbf16>, vector<16x256xf32> -> vector<16x256xf32>
    %c0_17 = arith.constant 0 : index
    %c1280_18 = arith.constant 1280 : index
    %24 = vector.load %arg3[%c0_17, %c1280_18] : memref<1x2560xf32, #tpu.memory_space<vmem>>, vector<1x256xf32>
    %25 = vector.broadcast %24 : vector<1x256xf32> to vector<16x256xf32>
    %26 = arith.addf %23, %25 : vector<16x256xf32>
    %cst_19 = arith.constant 0.000000e+00 : f32
    %27 = vector.broadcast %cst_19 : f32 to vector<16x256xf32>
    %28 = arith.maximumf %26, %27 : vector<16x256xf32>
    %29 = arith.truncf %28 : vector<16x256xf32> to vector<16x256xbf16>
    %c2816 = arith.constant 2816 : index
    %c0_20 = arith.constant 0 : index
    %30 = vector.load %arg2[%c2816, %c0_20] : memref<4096x256xbf16, #tpu.memory_space<vmem>>, vector<256x256xbf16>
    %cst_21 = arith.constant dense<0.000000e+00> : vector<16x256xf32>
    %31 = tpu.matmul %29, %30, %cst_21 {dimension_numbers = #tpu.dot_dimension_numbers<[1], [0], [0], [1], [0, 0, 1, 1], [], []>} : vector<16x256xbf16>, vector<256x256xbf16>, vector<16x256xf32> -> vector<16x256xf32>
    %c3072 = arith.constant 3072 : index
    %c0_22 = arith.constant 0 : index
    %32 = vector.load %arg2[%c3072, %c0_22] : memref<4096x256xbf16, #tpu.memory_space<vmem>>, vector<256x256xbf16>
    %cst_23 = arith.constant dense<0.000000e+00> : vector<16x256xf32>
    %33 = tpu.matmul %29, %32, %cst_23 {dimension_numbers = #tpu.dot_dimension_numbers<[1], [0], [0], [1], [0, 0, 1, 1], [], []>} : vector<16x256xbf16>, vector<256x256xbf16>, vector<16x256xf32> -> vector<16x256xf32>
    %34 = tpu.concatenate %31, %33 in 1 : vector<16x256xf32>, vector<16x256xf32> -> vector<16x512xf32>
    %c0_24 = arith.constant 0 : index
    %c1536_25 = arith.constant 1536 : index
    %35 = vector.load %arg3[%c0_24, %c1536_25] : memref<1x2560xf32, #tpu.memory_space<vmem>>, vector<1x512xf32>
    %36 = vector.broadcast %35 : vector<1x512xf32> to vector<16x512xf32>
    %37 = arith.addf %34, %36 : vector<16x512xf32>
    %cst_26 = arith.constant 0.000000e+00 : f32
    %38 = vector.broadcast %cst_26 : f32 to vector<16x512xf32>
    %39 = arith.maximumf %37, %38 : vector<16x512xf32>
    %40 = arith.truncf %39 : vector<16x512xf32> to vector<16x512xbf16>
    %c3328 = arith.constant 3328 : index
    %c0_27 = arith.constant 0 : index
    %41 = vector.load %arg2[%c3328, %c0_27] : memref<4096x256xbf16, #tpu.memory_space<vmem>>, vector<512x256xbf16>
    %cst_28 = arith.constant dense<0.000000e+00> : vector<16x256xf32>
    %42 = tpu.matmul %40, %41, %cst_28 {dimension_numbers = #tpu.dot_dimension_numbers<[1], [0], [0], [1], [0, 0, 1, 1], [], []>} : vector<16x512xbf16>, vector<512x256xbf16>, vector<16x256xf32> -> vector<16x256xf32>
    %c0_29 = arith.constant 0 : index
    %c2048 = arith.constant 2048 : index
    %43 = vector.load %arg3[%c0_29, %c2048] : memref<1x2560xf32, #tpu.memory_space<vmem>>, vector<1x256xf32>
    %44 = vector.broadcast %43 : vector<1x256xf32> to vector<16x256xf32>
    %45 = arith.addf %42, %44 : vector<16x256xf32>
    %cst_30 = arith.constant 0.000000e+00 : f32
    %46 = vector.broadcast %cst_30 : f32 to vector<16x256xf32>
    %47 = arith.maximumf %45, %46 : vector<16x256xf32>
    %48 = arith.truncf %47 : vector<16x256xf32> to vector<16x256xbf16>
    %c3840 = arith.constant 3840 : index
    %c0_31 = arith.constant 0 : index
    %49 = vector.load %arg2[%c3840, %c0_31] : memref<4096x256xbf16, #tpu.memory_space<vmem>>, vector<256x256xbf16>
    %cst_32 = arith.constant dense<0.000000e+00> : vector<16x256xf32>
    %50 = tpu.matmul %48, %49, %cst_32 {dimension_numbers = #tpu.dot_dimension_numbers<[1], [0], [0], [1], [0, 0, 1, 1], [], []>} : vector<16x256xbf16>, vector<256x256xbf16>, vector<16x256xf32> -> vector<16x256xf32>
    %c0_33 = arith.constant 0 : index
    %c2304 = arith.constant 2304 : index
    %51 = vector.load %arg3[%c0_33, %c2304] : memref<1x2560xf32, #tpu.memory_space<vmem>>, vector<1x256xf32>
    %52 = vector.broadcast %51 : vector<1x256xf32> to vector<16x256xf32>
    %53 = arith.addf %50, %52 : vector<16x256xf32>
    %c0_34 = arith.constant 0 : index
    %c0_35 = arith.constant 0 : index
    %54 = vector.load %arg4[%c0_34, %c0_35] : memref<16x256xf32, #tpu.memory_space<vmem>>, vector<16x256xf32>
    tpu.vector_store %arg4[%c0_34, %c0_35], %53 {strides = array<i32>} : memref<16x256xf32, #tpu.memory_space<vmem>>, vector<16x256xf32>,
    return
  }
  func.func @transform_0(%arg0: i32) -> (i32, i32) {
    %c0_i32 = arith.constant 0 : i32
    %c0_i32_0 = arith.constant 0 : i32
    return %arg0, %c0_i32 : i32, i32
  }
  func.func @transform_1(%arg0: i32) -> (i32, i32) {
    %c0_i32 = arith.constant 0 : i32
    %c0_i32_0 = arith.constant 0 : i32
    %c0_i32_1 = arith.constant 0 : i32
    return %c0_i32, %c0_i32_0 : i32, i32
  }
  func.func @transform_2(%arg0: i32) -> (i32, i32) {
    %c0_i32 = arith.constant 0 : i32
    %c0_i32_0 = arith.constant 0 : i32
    %c0_i32_1 = arith.constant 0 : i32
    return %c0_i32, %c0_i32_0 : i32, i32
  }
  func.func @transform_3(%arg0: i32) -> (i32, i32) {
    %c0_i32 = arith.constant 0 : i32
    %c0_i32_0 = arith.constant 0 : i32
    return %arg0, %c0_i32 : i32, i32
  }
}

</mosaic_0001>

<bundles_post_ra>
// kernel: rgbxrgb_forward.1
= control target key start
LH: loop header
LB: loop body
LE: loop exit
PB: predicated region body
PF: predicated region fallthrough
CT: control target
= control target key end

     0   :  { %8 = vsyncpa [#allocation3], 0  ;;  %s5565_s0 = inlined_call_operand.vmem [shape: bf16[16,768], index: 0, kind: input, shape index: {}]   ;;  %s5566_s1 = inlined_call_operand.hbm [shape: bf16[4096,256], index: 1, kind: input, shape index: {}]   ;;  %s5567_s2 = inlined_call_operand.hbm [shape: f32[1,2560], index: 2, kind: input, shape index: {}]   ;;  %s5568_s3 = inlined_call_operand.vmem [shape: f32[16,256], index: 3, kind: output, shape index: {}]  }
   0x1   :  { %9 = vsyncpa [#allocation5], 0  ;;  %s5415_s12 = smov [#allocation2]   ;;  %s5367_s16 = scalar_lea.hbm %s5566_s1, 65536 }
   0x2   :  { %s17_s13 = sshll.u32 %s5415_s12, 4  ;;  %p5368_p0 = scmp.ne.s32.totalorder %s5566_s1, %s5367_s16  ;;  %s18_s13 = int_to_ptr.vmem [resolvable:$true] %s17_s13 }
   0x3   :  { %p5371_p1 = scmp.lt.u32.totalorder %s5367_s16, %s5566_s1 }
   0x5   :  { %p5373_p2 = pnand %p5371_p1, %p5368_p0 }
   0x7   :  { %5376 = shalt.err (!%p5373_p2)
}
   0x8   :  { %s5377_s21 = scalar_lea.vmem %s18_s13, 65536  ;;  %p5382_p4 = scmp.lt.s32.totalorder %s18_s13, %s18_s13 }
   0x9   :  { %p5378_p3 = scmp.ne.s32.totalorder %s18_s13, %s5377_s21  ;;  %p5383_p5 = scmp.lt.s32.totalorder %s5377_s21, %s5377_s21 }
   0xb   :  { %p5384_p6 = por %p5383_p5, %p5382_p4 }
   0xd   :  { %p5385_p7 = pnand %p5384_p6, %p5378_p3 }
   0xf   :  { %5388 = shalt.err (!%p5385_p7)
}
  0x10   :  { %s5416_s22 = smov 128   ;;  %s5417_s23 = smov 8  }
  0x11   :  { %23 = dma.hbm_to_vmem [thread:$0]  %s5566_s1, 65536, %s18_s13, [#allocation3], %s5416_s22, %s5416_s22, %s5417_s23  }
  0x12   :  { %s5418_s26 = smov [#allocation4]   ;;  %s5389_s30 = scalar_lea.hbm %s5567_s2, 320 }
  0x13   :  { %s30_s27 = sshll.u32 %s5418_s26, 4  ;;  %p5390_p8 = scmp.ne.s32.totalorder %s5567_s2, %s5389_s30  ;;  %s31_s27 = int_to_ptr.vmem [resolvable:$true] %s30_s27 }
  0x14   :  { %p5393_p9 = scmp.lt.u32.totalorder %s5389_s30, %s5567_s2 }
  0x16   :  { %p5395_p10 = pnand %p5393_p9, %p5390_p8 }
  0x18   :  { %5398 = shalt.err (!%p5395_p10)
}
  0x19   :  { %s5399_s8 = scalar_lea.vmem %s31_s27, 320  ;;  %p5404_p12 = scmp.lt.s32.totalorder %s31_s27, %s31_s27 }
  0x1a   :  { %p5400_p11 = scmp.ne.s32.totalorder %s31_s27, %s5399_s8  ;;  %p5405_p13 = scmp.lt.s32.totalorder %s5399_s8, %s5399_s8 }
  0x1c   :  { %p5406_p0 = por %p5405_p13, %p5404_p12 }
  0x1e   :  { %p5407_p1 = pnand %p5406_p0, %p5400_p11 }
  0x20   :  { %5410 = shalt.err (!%p5407_p1)
}
  0x21   :  { %33 = dma.hbm_to_vmem [thread:$0]  %s5567_s2, 320, %s31_s27, [#allocation5]  }
  0x22   :  { %5411 = dma.done.wait [#allocation3], 65536  }
  0x23   :  { %5412 = vsyncadd [#allocation3], 4294901760 }
  0x24   :  { %5413 = dma.done.wait [#allocation5], 320  }
  0x25   :  { %5414 = vsyncadd [#allocation5], 4294966976  ;;  %v4590_v0 = vld [vmem:[#allocation2 + $0x4] ss:$8 sps:$4 sm:$0xff]   ;;  %v4592_v1 = vld [vmem:[#allocation2] ss:$8 sps:$4 sm:$0xff]  }
  0x26   :  { %664 = vmatprep.subr.bf16.mxu0 %v4590_v0  ;;  %v4593_v2 = vld [vmem:[#allocation2 + $0x14] ss:$8 sps:$4 sm:$0xff]   ;;  %v4595_v3 = vld [vmem:[#allocation2 + $0x10] ss:$8 sps:$4 sm:$0xff]   ;;  %v4596_v4 = vld [vmem:[#allocation2 + $0x24] ss:$8 sps:$4 sm:$0xff]  }
  0x27   :  { %665 = vmatpush1.bf16.msra.mxu0 %v4592_v1  ;;  %v4598_v5 = vld [vmem:[#allocation2 + $0x20] ss:$8 sps:$4 sm:$0xff]   ;;  %v4599_v6 = vld [vmem:[#allocation2 + $0x34] ss:$8 sps:$4 sm:$0xff]   ;;  %v4601_v7 = vld [vmem:[#allocation2 + $0x30] ss:$8 sps:$4 sm:$0xff]  }
  0x28   :  { %666 = vmatprep.subr.bf16.mxu0 %v4593_v2  ;;  %v4602_v8 = vld [vmem:[#allocation2 + $0x44] ss:$8 sps:$4 sm:$0xff]   ;;  %v4604_v9 = vld [vmem:[#allocation2 + $0x40] ss:$8 sps:$4 sm:$0xff]   ;;  %v4605_v10 = vld [vmem:[#allocation2 + $0x54] ss:$8 sps:$4 sm:$0xff]  }
  0x29   :  { %v4607_v11 = vld [vmem:[#allocation2 + $0x50] ss:$8 sps:$4 sm:$0xff]   ;;  %v4608_v12 = vld [vmem:[#allocation2 + $0x64] ss:$8 sps:$4 sm:$0xff]   ;;  %v4610_v14 = vld [vmem:[#allocation2 + $0x60] ss:$8 sps:$4 sm:$0xff]  }
  0x2a   :  { %v4640_v13 = vld [vmem:[%s5565_s0 + $0x4] ss:$24 sps:$4 sm:$0xff]   ;;  %v4613_v16 = vld [vmem:[#allocation2 + $0x70] ss:$8 sps:$4 sm:$0xff]   ;;  %v4616_v18 = vld [vmem:[#allocation2 + $0x80] ss:$8 sps:$4 sm:$0xff]  }
  0x2b   :  { %667 = vmatpush1.bf16.msra.mxu0 %v4595_v3  ;;  %v4611_v15 = vld [vmem:[#allocation2 + $0x74] ss:$8 sps:$4 sm:$0xff]   ;;  %696 = vmatprep.mubr.bf16.mxu0 %v4640_v13  ;;  %v4614_v17 = vld [vmem:[#allocation2 + $0x84] ss:$8 sps:$4 sm:$0xff]   ;;  %v4619_v20 = vld [vmem:[#allocation2 + $0x90] ss:$8 sps:$4 sm:$0xff]  }
  0x2c   :  { %668 = vmatprep.subr.bf16.mxu0 %v4596_v4  ;;  %v4617_v19 = vld [vmem:[#allocation2 + $0x94] ss:$8 sps:$4 sm:$0xff]   ;;  %v4620_v21 = vld [vmem:[#allocation2 + $0xa4] ss:$8 sps:$4 sm:$0xff]   ;;  %v4622_v22 = vld [vmem:[#allocation2 + $0xa0] ss:$8 sps:$4 sm:$0xff]  }
  0x2d   :  { %v4623_v23 = vld [vmem:[#allocation2 + $0xb4] ss:$8 sps:$4 sm:$0xff]   ;;  %v4625_v24 = vld [vmem:[#allocation2 + $0xb0] ss:$8 sps:$4 sm:$0xff]   ;;  %v4626_v25 = vld [vmem:[#allocation2 + $0xc4] ss:$8 sps:$4 sm:$0xff]  }
  0x2e   :  { %v4628_v26 = vld [vmem:[#allocation2 + $0xc0] ss:$8 sps:$4 sm:$0xff]   ;;  %v4629_v27 = vld [vmem:[#allocation2 + $0xd4] ss:$8 sps:$4 sm:$0xff]   ;;  %v4631_v28 = vld [vmem:[#allocation2 + $0xd0] ss:$8 sps:$4 sm:$0xff]  }
  0x2f   :  { %669 = vmatpush1.bf16.msra.mxu0 %v4598_v5  ;;  %v4632_v29 = vld [vmem:[#allocation2 + $0xe4] ss:$8 sps:$4 sm:$0xff]   ;;  %v4634_v30 = vld [vmem:[#allocation2 + $0xe0] ss:$8 sps:$4 sm:$0xff]   ;;  %v4635_v31 = vld [vmem:[#allocation2 + $0xf4] ss:$8 sps:$4 sm:$0xff]  }
  0x30   :  { %670 = vmatprep.subr.bf16.mxu0 %v4599_v6  ;;  %v4637_v32 = vld [vmem:[#allocation2 + $0xf0] ss:$8 sps:$4 sm:$0xff]   ;;  %v4643_v33 = vld [vmem:[#allocation2 + $0x104] ss:$8 sps:$4 sm:$0xff]   ;;  %v4641_v35 = vld [vmem:[#allocation2 + $0x100] ss:$8 sps:$4 sm:$0xff]  }
  0x31   :  { %v4638_v34 = vld [vmem:[%s5565_s0] ss:$24 sps:$4 sm:$0xff]   ;;  %v4691_v36 = vld [vmem:[%s5565_s0 + $0xc] ss:$24 sps:$4 sm:$0xff]   ;;  %v4646_v37 = vld [vmem:[#allocation2 + $0x114] ss:$8 sps:$4 sm:$0xff]  }
  0x32   :  { %v4644_v38 = vld [vmem:[#allocation2 + $0x110] ss:$8 sps:$4 sm:$0xff]   ;;  %v4649_v39 = vld [vmem:[#allocation2 + $0x124] ss:$8 sps:$4 sm:$0xff]   ;;  %v4745_v41 = vld [vmem:[#allocation2 + $0x300] ss:$8 sps:$4 sm:$0xff]  }
  0x33   :  { %671 = vmatpush1.bf16.msra.mxu0 %v4601_v7  ;;  %v4743_v40 = vld [vmem:[#allocation2 + $0x304] ss:$8 sps:$4 sm:$0xff]   ;;  %v4647_v42 = vld [vmem:[#allocation2 + $0x120] ss:$8 sps:$4 sm:$0xff]   ;;  %v4749_v43 = vld [vmem:[#allocation2 + $0x314] ss:$8 sps:$4 sm:$0xff]  }
  0x34   :  { %672 = vmatprep.subr.bf16.mxu0 %v4602_v8  ;;  %987 = vmatprep.subr.bf16.mxu1 %v4743_v40  ;;  %v4751_v44 = vld [vmem:[#allocation2 + $0x310] ss:$8 sps:$4 sm:$0xff]   ;;  %v4652_v45 = vld [vmem:[#allocation2 + $0x134] ss:$8 sps:$4 sm:$0xff]   ;;  %v4755_v47 = vld [vmem:[#allocation2 + $0x324] ss:$8 sps:$4 sm:$0xff]  }
  0x35   :  { %988 = vmatpush1.bf16.msra.mxu1 %v4745_v41  ;;  %v4650_v46 = vld [vmem:[#allocation2 + $0x130] ss:$8 sps:$4 sm:$0xff]   ;;  %v4655_v48 = vld [vmem:[#allocation2 + $0x144] ss:$8 sps:$4 sm:$0xff]   ;;  %v4757_v49 = vld [vmem:[#allocation2 + $0x320] ss:$8 sps:$4 sm:$0xff]  }
  0x36   :  { %989 = vmatprep.subr.bf16.mxu1 %v4749_v43  ;;  %v4761_v50 = vld [vmem:[#allocation2 + $0x334] ss:$8 sps:$4 sm:$0xff]   ;;  %v4653_v51 = vld [vmem:[#allocation2 + $0x140] ss:$8 sps:$4 sm:$0xff]   ;;  %v4763_v53 = vld [vmem:[#allocation2 + $0x330] ss:$8 sps:$4 sm:$0xff]  }
  0x37   :  { %673 = vmatpush1.bf16.msra.mxu0 %v4604_v9  ;;  %v4658_v52 = vld [vmem:[#allocation2 + $0x154] ss:$8 sps:$4 sm:$0xff]   ;;  %v4767_v54 = vld [vmem:[#allocation2 + $0x344] ss:$8 sps:$4 sm:$0xff]   ;;  %v4656_v55 = vld [vmem:[#allocation2 + $0x150] ss:$8 sps:$4 sm:$0xff]  }
  0x38   :  { %674 = vmatprep.subr.bf16.mxu0 %v4605_v10  ;;  %v4661_v56 = vld [vmem:[#allocation2 + $0x164] ss:$8 sps:$4 sm:$0xff]   ;;  %v4769_v57 = vld [vmem:[#allocation2 + $0x340] ss:$8 sps:$4 sm:$0xff]   ;;  %v4773_v58 = vld [vmem:[#allocation2 + $0x354] ss:$8 sps:$4 sm:$0xff]  }
  0x39   :  { %990 = vmatpush1.bf16.msra.mxu1 %v4751_v44  ;;  %v4659_v59 = vld [vmem:[#allocation2 + $0x160] ss:$8 sps:$4 sm:$0xff]   ;;  %v4664_v60 = vld [vmem:[#allocation2 + $0x174] ss:$8 sps:$4 sm:$0xff]   ;;  %v4775_v61 = vld [vmem:[#allocation2 + $0x350] ss:$8 sps:$4 sm:$0xff]  }
  0x3a   :  { %991 = vmatprep.subr.bf16.mxu1 %v4755_v47  ;;  %v4779_v62 = vld [vmem:[#allocation2 + $0x364] ss:$8 sps:$4 sm:$0xff]   ;;  %v4662_v63 = vld [vmem:[#allocation2 + $0x170] ss:$8 sps:$4 sm:$0xff]   ;;  %v4781_v1 = vld [vmem:[#allocation2 + $0x360] ss:$8 sps:$4 sm:$0xff]  }
  0x3b   :  { %675 = vmatpush1.bf16.msra.mxu0 %v4607_v11  ;;  %v4667_v0 = vld [vmem:[#allocation2 + $0x184] ss:$8 sps:$4 sm:$0xff]   ;;  %v4785_v2 = vld [vmem:[#allocation2 + $0x374] ss:$8 sps:$4 sm:$0xff]   ;;  %v4665_v3 = vld [vmem:[#allocation2 + $0x180] ss:$8 sps:$4 sm:$0xff]  }
  0x3c   :  { %676 = vmatprep.subr.bf16.mxu0 %v4608_v12  ;;  %v4670_v4 = vld [vmem:[#allocation2 + $0x194] ss:$8 sps:$4 sm:$0xff]   ;;  %v4787_v5 = vld [vmem:[#allocation2 + $0x370] ss:$8 sps:$4 sm:$0xff]   ;;  %v4791_v6 = vld [vmem:[#allocation2 + $0x384] ss:$8 sps:$4 sm:$0xff]  }
  0x3d   :  { %992 = vmatpush1.bf16.msra.mxu1 %v4757_v49  ;;  %v4668_v7 = vld [vmem:[#allocation2 + $0x190] ss:$8 sps:$4 sm:$0xff]   ;;  %v4673_v8 = vld [vmem:[#allocation2 + $0x1a4] ss:$8 sps:$4 sm:$0xff]   ;;  %v4793_v9 = vld [vmem:[#allocation2 + $0x380] ss:$8 sps:$4 sm:$0xff]  }
  0x3e   :  { %993 = vmatprep.subr.bf16.mxu1 %v4761_v50  ;;  %v4797_v10 = vld [vmem:[#allocation2 + $0x394] ss:$8 sps:$4 sm:$0xff]   ;;  %v4671_v11 = vld [vmem:[#allocation2 + $0x1a0] ss:$8 sps:$4 sm:$0xff]   ;;  %v4799_v13 = vld [vmem:[#allocation2 + $0x390] ss:$8 sps:$4 sm:$0xff]  }
  0x3f   :  { %677 = vmatpush1.bf16.msra.mxu0 %v4610_v14  ;;  %v4676_v12 = vld [vmem:[#allocation2 + $0x1b4] ss:$8 sps:$4 sm:$0xff]   ;;  %v4803_v14 = vld [vmem:[#allocation2 + $0x3a4] ss:$8 sps:$4 sm:$0xff]   ;;  %v4701_v40 = vld [vmem:[#allocation2 + $0x230] ss:$8 sps:$4 sm:$0xff]  }
  0x40   :  { %678 = vmatprep.subr.bf16.mxu0 %v4611_v15  ;;  %v4674_v15 = vld [vmem:[#allocation2 + $0x1b0] ss:$8 sps:$4 sm:$0xff]   ;;  %v4706_v41 = vld [vmem:[#allocation2 + $0x244] ss:$8 sps:$4 sm:$0xff]   ;;  %v4709_v43 = vld [vmem:[#allocation2 + $0x254] ss:$8 sps:$4 sm:$0xff]  }
  0x41   :  { %994 = vmatpush1.bf16.msra.mxu1 %v4763_v53  ;;  %v4707_v44 = vld [vmem:[#allocation2 + $0x250] ss:$8 sps:$4 sm:$0xff]   ;;  %v4715_v47 = vld [vmem:[#allocation2 + $0x274] ss:$8 sps:$4 sm:$0xff]   ;;  %v4718_v49 = vld [vmem:[#allocation2 + $0x284] ss:$8 sps:$4 sm:$0xff]  }
  0x42   :  { %995 = vmatprep.subr.bf16.mxu1 %v4767_v54  ;;  %v4716_v50 = vld [vmem:[#allocation2 + $0x280] ss:$8 sps:$4 sm:$0xff]   ;;  %v4724_v53 = vld [vmem:[#allocation2 + $0x2a4] ss:$8 sps:$4 sm:$0xff]  }
  0x43   :  { %679 = vmatpush1.bf16.msra.mxu0 %v4613_v16  ;;  %v4679_v16 = vld [vmem:[#allocation2 + $0x1c4] ss:$8 sps:$4 sm:$0xff]   ;;  %v4722_v54 = vld [vmem:[#allocation2 + $0x2a0] ss:$8 sps:$4 sm:$0xff]  }
  0x44   :  { %680 = vmatprep.subr.bf16.mxu0 %v4614_v17  ;;  %v4805_v17 = vld [vmem:[#allocation2 + $0x3a0] ss:$8 sps:$4 sm:$0xff]  }
  0x45   :  { %996 = vmatpush1.bf16.msra.mxu1 %v4769_v57  ;;  %v4730_v57 = vld [vmem:[#allocation2 + $0x2c4] ss:$8 sps:$4 sm:$0xff]  }
  0x46   :  { %997 = vmatprep.subr.bf16.mxu1 %v4773_v58  ;;  %v4728_v58 = vld [vmem:[#allocation2 + $0x2c0] ss:$8 sps:$4 sm:$0xff]  }
  0x47   :  { %681 = vmatpush1.bf16.msra.mxu0 %v4616_v18  ;;  %v4809_v18 = vld [vmem:[#allocation2 + $0x3b4] ss:$8 sps:$4 sm:$0xff]  }
  0x48   :  { %682 = vmatprep.subr.bf16.mxu0 %v4617_v19  ;;  %v4677_v19 = vld [vmem:[#allocation2 + $0x1c0] ss:$8 sps:$4 sm:$0xff]  }
  0x49   :  { %998 = vmatpush1.bf16.msra.mxu1 %v4775_v61  ;;  %v4736_v61 = vld [vmem:[#allocation2 + $0x2e4] ss:$8 sps:$4 sm:$0xff]  }
  0x4a   :  { %999 = vmatprep.subr.bf16.mxu1 %v4779_v62  ;;  %v4734_v62 = vld [vmem:[#allocation2 + $0x2e0] ss:$8 sps:$4 sm:$0xff]  }
  0x4b   :  { %683 = vmatpush1.bf16.msra.mxu0 %v4619_v20  ;;  %v4682_v20 = vld [vmem:[#allocation2 + $0x1d4] ss:$8 sps:$4 sm:$0xff]  }
  0x4c   :  { %684 = vmatprep.subr.bf16.mxu0 %v4620_v21  ;;  %v4811_v21 = vld [vmem:[#allocation2 + $0x3b0] ss:$8 sps:$4 sm:$0xff]  }
  0x4d   :  { %1000 = vmatpush1.bf16.msra.mxu1 %v4781_v1  ;;  %v4748_v1 = vld [vmem:[#allocation2 + $0x604] ss:$8 sps:$4 sm:$0xff]  }
  0x4e   :  { %1001 = vmatprep.subr.bf16.mxu1 %v4785_v2  ;;  %v4740_v2 = vld [vmem:[%s5565_s0 + $0x10] ss:$24 sps:$4 sm:$0xff]  }
  0x4f   :  { %685 = vmatpush1.bf16.msra.mxu0 %v4622_v22  ;;  %v4815_v22 = vld [vmem:[#allocation2 + $0x3c4] ss:$8 sps:$4 sm:$0xff]  }
  0x50   :  { %686 = vmatprep.subr.bf16.mxu0 %v4623_v23  ;;  %v4680_v23 = vld [vmem:[#allocation2 + $0x1d0] ss:$8 sps:$4 sm:$0xff]  }
  0x51   :  { %1002 = vmatpush1.bf16.msra.mxu1 %v4787_v5  ;;  %v4752_v5 = vld [vmem:[#allocation2 + $0x610] ss:$8 sps:$4 sm:$0xff]  }
  0x52   :  { %1003 = vmatprep.subr.bf16.mxu1 %v4791_v6  ;;  %v4760_v6 = vld [vmem:[#allocation2 + $0x624] ss:$8 sps:$4 sm:$0xff]  }
  0x53   :  { %687 = vmatpush1.bf16.msra.mxu0 %v4625_v24  ;;  %v4685_v24 = vld [vmem:[#allocation2 + $0x1e4] ss:$8 sps:$4 sm:$0xff]  }
  0x54   :  { %688 = vmatprep.subr.bf16.mxu0 %v4626_v25  ;;  %v4817_v25 = vld [vmem:[#allocation2 + $0x3c0] ss:$8 sps:$4 sm:$0xff]  }
  0x55   :  { %1004 = vmatpush1.bf16.msra.mxu1 %v4793_v9  ;;  %v4764_v9 = vld [vmem:[#allocation2 + $0x630] ss:$8 sps:$4 sm:$0xff]  }
  0x56   :  { %1005 = vmatprep.subr.bf16.mxu1 %v4797_v10  ;;  %v4772_v10 = vld [vmem:[#allocation2 + $0x644] ss:$8 sps:$4 sm:$0xff]  }
  0x57   :  { %689 = vmatpush1.bf16.msra.mxu0 %v4628_v26  ;;  %v4821_v26 = vld [vmem:[#allocation2 + $0x3d4] ss:$8 sps:$4 sm:$0xff]  }
  0x58   :  { %690 = vmatprep.subr.bf16.mxu0 %v4629_v27  ;;  %v4683_v27 = vld [vmem:[#allocation2 + $0x1e0] ss:$8 sps:$4 sm:$0xff]  }
  0x59   :  { %1006 = vmatpush1.bf16.msra.mxu1 %v4799_v13  ;;  %v4776_v13 = vld [vmem:[#allocation2 + $0x650] ss:$8 sps:$4 sm:$0xff]  }
  0x5a   :  { %1007 = vmatprep.subr.bf16.mxu1 %v4803_v14  ;;  %v4784_v14 = vld [vmem:[#allocation2 + $0x664] ss:$8 sps:$4 sm:$0xff]  }
  0x5b   :  { %691 = vmatpush1.bf16.msra.mxu0 %v4631_v28  ;;  %v4688_v28 = vld [vmem:[#allocation2 + $0x1f4] ss:$8 sps:$4 sm:$0xff]  }
  0x5c   :  { %692 = vmatprep.subr.bf16.mxu0 %v4632_v29  ;;  %v4823_v29 = vld [vmem:[#allocation2 + $0x3d0] ss:$8 sps:$4 sm:$0xff]  }
  0x5d   :  { %1008 = vmatpush1.bf16.msra.mxu1 %v4805_v17  ;;  %v4788_v17 = vld [vmem:[#allocation2 + $0x670] ss:$8 sps:$4 sm:$0xff]  }
  0x5e   :  { %1009 = vmatprep.subr.bf16.mxu1 %v4809_v18  ;;  %v4796_v18 = vld [vmem:[#allocation2 + $0x684] ss:$8 sps:$4 sm:$0xff]  }
  0x5f   :  { %693 = vmatpush1.bf16.msra.mxu0 %v4634_v30  ;;  %v4686_v30 = vld [vmem:[#allocation2 + $0x1f0] ss:$8 sps:$4 sm:$0xff]  }
  0x60   :  { %694 = vmatprep.subr.bf16.mxu0 %v4635_v31  ;;  %v4694_v31 = vld [vmem:[#allocation2 + $0x204] ss:$8 sps:$4 sm:$0xff]  }
  0x61   :  { %1010 = vmatpush1.bf16.msra.mxu1 %v4811_v21  ;;  %v4800_v21 = vld [vmem:[#allocation2 + $0x690] ss:$8 sps:$4 sm:$0xff]  }
  0x62   :  { %1011 = vmatprep.subr.bf16.mxu1 %v4815_v22  ;;  %v4808_v22 = vld [vmem:[#allocation2 + $0x6a4] ss:$8 sps:$4 sm:$0xff]  }
  0x63   :  { %695 = vmatpush1.bf16.msra.mxu0 %v4637_v32  ;;  %v4689_v32 = vld [vmem:[%s5565_s0 + $0x8] ss:$24 sps:$4 sm:$0xff]  }
  0x64   :  { %707 = vmatprep.subr.bf16.mxu0 %v4643_v33  ;;  %v4692_v33 = vld [vmem:[#allocation2 + $0x200] ss:$8 sps:$4 sm:$0xff]  }
  0x65   :  { %1012 = vmatpush1.bf16.msra.mxu1 %v4817_v25  ;;  %v4812_v25 = vld [vmem:[#allocation2 + $0x6b0] ss:$8 sps:$4 sm:$0xff]  }
  0x66   :  { %697 = vmatmul.mubr.bf16.vlgmr.msra.gmra.mrb[0].mxu0 %v4638_v34  ;;  %1013 = vmatprep.subr.bf16.mxu1 %v4821_v26  ;;  %v4742_v34 = vld [vmem:[%s5565_s0 + $0x14] ss:$24 sps:$4 sm:$0xff]  }
  0x67   :  { %708 = vmatpush1.bf16.msra.mxu0 %v4641_v35  ;;  %739 = vmatprep.mubr.bf16.mxu0 %v4691_v36  ;;  %v4697_v35 = vld [vmem:[#allocation2 + $0x214] ss:$8 sps:$4 sm:$0xff]   ;;  %v4695_v36 = vld [vmem:[#allocation2 + $0x210] ss:$8 sps:$4 sm:$0xff]   ;;  %v4820_v26 = vld [vmem:[#allocation2 + $0x6c4] ss:$8 sps:$4 sm:$0xff]  }
  0x68   :  { %709 = vmatprep.subr.bf16.mxu0 %v4646_v37  ;;  %v4700_v37 = vld [vmem:[#allocation2 + $0x224] ss:$8 sps:$4 sm:$0xff]  }
  0x69   :  { %1014 = vmatpush1.bf16.msra.mxu1 %v4823_v29  ;;  %v4824_v29 = vld [vmem:[#allocation2 + $0x6d0] ss:$8 sps:$4 sm:$0xff]  }
  0x6b   :  { %710 = vmatpush1.bf16.msra.mxu0 %v4644_v38  ;;  %v4698_v38 = vld [vmem:[#allocation2 + $0x220] ss:$8 sps:$4 sm:$0xff]  }
  0x6c   :  { %711 = vmatprep.subr.bf16.mxu0 %v4649_v39  ;;  %v4703_v39 = vld [vmem:[#allocation2 + $0x234] ss:$8 sps:$4 sm:$0xff]  }
  0x6f   :  { %712 = vmatpush1.bf16.msra.mxu0 %v4647_v42  ;;  %v4704_v42 = vld [vmem:[#allocation2 + $0x240] ss:$8 sps:$4 sm:$0xff]  }
  0x70   :  { %713 = vmatprep.subr.bf16.mxu0 %v4652_v45  ;;  %v4712_v45 = vld [vmem:[#allocation2 + $0x264] ss:$8 sps:$4 sm:$0xff]  }
  0x73   :  { %714 = vmatpush1.bf16.msra.mxu0 %v4650_v46  ;;  %v4710_v46 = vld [vmem:[#allocation2 + $0x260] ss:$8 sps:$4 sm:$0xff]  }
  0x74   :  { %715 = vmatprep.subr.bf16.mxu0 %v4655_v48  ;;  %v4713_v48 = vld [vmem:[#allocation2 + $0x270] ss:$8 sps:$4 sm:$0xff]  }
  0x77   :  { %716 = vmatpush1.bf16.msra.mxu0 %v4653_v51  ;;  %v4721_v51 = vld [vmem:[#allocation2 + $0x294] ss:$8 sps:$4 sm:$0xff]  }
  0x78   :  { %717 = vmatprep.subr.bf16.mxu0 %v4658_v52  ;;  %v4719_v52 = vld [vmem:[#allocation2 + $0x290] ss:$8 sps:$4 sm:$0xff]  }
  0x7b   :  { %718 = vmatpush1.bf16.msra.mxu0 %v4656_v55  ;;  %v4727_v55 = vld [vmem:[#allocation2 + $0x2b4] ss:$8 sps:$4 sm:$0xff]  }
  0x7c   :  { %719 = vmatprep.subr.bf16.mxu0 %v4661_v56  ;;  %v4725_v56 = vld [vmem:[#allocation2 + $0x2b0] ss:$8 sps:$4 sm:$0xff]  }
  0x7f   :  { %720 = vmatpush1.bf16.msra.mxu0 %v4659_v59  ;;  %v4733_v59 = vld [vmem:[#allocation2 + $0x2d4] ss:$8 sps:$4 sm:$0xff]  }
  0x80   :  { %721 = vmatprep.subr.bf16.mxu0 %v4664_v60  ;;  %v4731_v60 = vld [vmem:[#allocation2 + $0x2d0] ss:$8 sps:$4 sm:$0xff]  }
  0x83   :  { %722 = vmatpush1.bf16.msra.mxu0 %v4662_v63  ;;  %v4739_v63 = vld [vmem:[#allocation2 + $0x2f4] ss:$8 sps:$4 sm:$0xff]  }
  0x84   :  { %723 = vmatprep.subr.bf16.mxu0 %v4667_v0  ;;  %v4737_v0 = vld [vmem:[#allocation2 + $0x2f0] ss:$8 sps:$4 sm:$0xff]  }
  0x87   :  { %724 = vmatpush1.bf16.msra.mxu0 %v4665_v3  ;;  %v4746_v3 = vld [vmem:[#allocation2 + $0x600] ss:$8 sps:$4 sm:$0xff]  }
  0x88   :  { %725 = vmatprep.subr.bf16.mxu0 %v4670_v4  ;;  %v4754_v4 = vld [vmem:[#allocation2 + $0x614] ss:$8 sps:$4 sm:$0xff]  }
  0x8b   :  { %726 = vmatpush1.bf16.msra.mxu0 %v4668_v7  ;;  %v4758_v7 = vld [vmem:[#allocation2 + $0x620] ss:$8 sps:$4 sm:$0xff]  }
  0x8c   :  { %727 = vmatprep.subr.bf16.mxu0 %v4673_v8  ;;  %v4766_v8 = vld [vmem:[#allocation2 + $0x634] ss:$8 sps:$4 sm:$0xff]  }
  0x8f   :  { %728 = vmatpush1.bf16.msra.mxu0 %v4671_v11  ;;  %v4770_v11 = vld [vmem:[#allocation2 + $0x640] ss:$8 sps:$4 sm:$0xff]  }
  0x90   :  { %729 = vmatprep.subr.bf16.mxu0 %v4676_v12  ;;  %v4778_v12 = vld [vmem:[#allocation2 + $0x654] ss:$8 sps:$4 sm:$0xff]  }
  0x93   :  { %730 = vmatpush1.bf16.msra.mxu0 %v4674_v15  ;;  %v4782_v15 = vld [vmem:[#allocation2 + $0x660] ss:$8 sps:$4 sm:$0xff]  }
  0x94   :  { %731 = vmatprep.subr.bf16.mxu0 %v4679_v16  ;;  %v4790_v16 = vld [vmem:[#allocation2 + $0x674] ss:$8 sps:$4 sm:$0xff]  }
  0x97   :  { %732 = vmatpush1.bf16.msra.mxu0 %v4677_v19  ;;  %v4794_v19 = vld [vmem:[#allocation2 + $0x680] ss:$8 sps:$4 sm:$0xff]  }
  0x98   :  { %733 = vmatprep.subr.bf16.mxu0 %v4682_v20  ;;  %v4802_v20 = vld [vmem:[#allocation2 + $0x694] ss:$8 sps:$4 sm:$0xff]  }
  0x9b   :  { %734 = vmatpush1.bf16.msra.mxu0 %v4680_v23  ;;  %v4806_v23 = vld [vmem:[#allocation2 + $0x6a0] ss:$8 sps:$4 sm:$0xff]  }
  0x9c   :  { %735 = vmatprep.subr.bf16.mxu0 %v4685_v24  ;;  %v4814_v24 = vld [vmem:[#allocation2 + $0x6b4] ss:$8 sps:$4 sm:$0xff]  }
  0x9f   :  { %736 = vmatpush1.bf16.msra.mxu0 %v4683_v27  ;;  %v4818_v27 = vld [vmem:[#allocation2 + $0x6c0] ss:$8 sps:$4 sm:$0xff]  }
  0xa0   :  { %737 = vmatprep.subr.bf16.mxu0 %v4688_v28  ;;  %v4826_v28 = vld [vmem:[#allocation2 + $0x6d4] ss:$8 sps:$4 sm:$0xff]  }
  0xa3   :  { %738 = vmatpush1.bf16.msra.mxu0 %v4686_v30  ;;  %v4827_v30 = vld [vmem:[#allocation2 + $0x3e4] ss:$8 sps:$4 sm:$0xff]  }
  0xa4   :  { %750 = vmatprep.subr.bf16.mxu0 %v4694_v31  ;;  %v4829_v31 = vld [vmem:[#allocation2 + $0x3e0] ss:$8 sps:$4 sm:$0xff]   ;;  %1015 = vmatprep.subr.bf16.mxu1 %v4827_v30  ;;  %v4896_v30 = vld [vmem:[#allocation2 + $0x530] ss:$8 sps:$4 sm:$0xff]  }
  0xa5   :  { %1016 = vmatpush1.bf16.msra.mxu1 %v4829_v31  ;;  %v4901_v31 = vld [vmem:[#allocation2 + $0x544] ss:$8 sps:$4 sm:$0xff]  }
  0xa6   :  { %740 = vmatmul.mubr.bf16.vlgmr.msra.gmra.mrb[0].mxu0 %v4689_v32  ;;  %v4832_v32 = vld [vmem:[#allocation2 + $0x6e4] ss:$8 sps:$4 sm:$0xff]  }
  0xa7   :  { %751 = vmatpush1.bf16.msra.mxu0 %v4692_v33  ;;  %782 = vmatprep.mubr.bf16.mxu0 %v4742_v34  ;;  %v4830_v33 = vld [vmem:[#allocation2 + $0x6e0] ss:$8 sps:$4 sm:$0xff]   ;;  %v4833_v34 = vld [vmem:[#allocation2 + $0x3f4] ss:$8 sps:$4 sm:$0xff]  }
  0xa8   :  { %752 = vmatprep.subr.bf16.mxu0 %v4697_v35  ;;  %v4835_v35 = vld [vmem:[#allocation2 + $0x3f0] ss:$8 sps:$4 sm:$0xff]   ;;  %1017 = vmatprep.subr.bf16.mxu1 %v4833_v34 }
  0xa9   :  { %1018 = vmatpush1.bf16.msra.mxu1 %v4835_v35  ;;  %v4902_v34 = vld [vmem:[#allocation2 + $0x550] ss:$8 sps:$4 sm:$0xff]   ;;  %v4907_v35 = vld [vmem:[#allocation2 + $0x564] ss:$8 sps:$4 sm:$0xff]  }
  0xab   :  { %753 = vmatpush1.bf16.msra.mxu0 %v4695_v36  ;;  %v4838_v36 = vld [vmem:[#allocation2 + $0x6f4] ss:$8 sps:$4 sm:$0xff]  }
  0xac   :  { %754 = vmatprep.subr.bf16.mxu0 %v4700_v37  ;;  %v4836_v37 = vld [vmem:[#allocation2 + $0x6f0] ss:$8 sps:$4 sm:$0xff]  }
  0xaf   :  { %755 = vmatpush1.bf16.msra.mxu0 %v4698_v38  ;;  %v4841_v38 = vld [vmem:[#allocation2 + $0x404] ss:$8 sps:$4 sm:$0xff]  }
  0xb0   :  { %756 = vmatprep.subr.bf16.mxu0 %v4703_v39  ;;  %1222 = vmatprep.subr.bf16.mxu1 %v4841_v38  ;;  %v144_v39 = vlaneseq  ;;  %v4908_v38 = vld [vmem:[#allocation2 + $0x570] ss:$8 sps:$4 sm:$0xff]  }
  0xb3   :  { %757 = vmatpush1.bf16.msra.mxu0 %v4701_v40  ;;  %v5481_v40 = vshrl.u32 %v144_v39, 7  ;;  %v4913_v39 = vld [vmem:[#allocation2 + $0x584] ss:$8 sps:$4 sm:$0xff]  }
  0xb4   :  { %758 = vmatprep.subr.bf16.mxu0 %v4706_v41 }
  0xb5   :  { %v5484_v41 = vsub.s32 0, %v5481_v40 }
  0xb7   :  { %759 = vmatpush1.bf16.msra.mxu0 %v4704_v42  ;;  %v142_v42 = vld [vmem:[#allocation4] sm:$0x3] }
  0xb8   :  { %760 = vmatprep.subr.bf16.mxu0 %v4709_v43  ;;  %v5487_v43 = vsub.s32 1, %v5481_v40 }
  0xbb   :  { %761 = vmatpush1.bf16.msra.mxu0 %v4707_v44  ;;  %v147_v44 = vrot.slane %v142_v42, %v5484_v41 }
  0xbc   :  { %762 = vmatprep.subr.bf16.mxu0 %v4712_v45 }
  0xbf   :  { %763 = vmatpush1.bf16.msra.mxu0 %v4710_v46  ;;  %v151_v46 = vrot.slane %v142_v42, %v5487_v43  ;;  %v4911_v42 = vld [vmem:[#allocation2 + $0x580] ss:$8 sps:$4 sm:$0xff]  }
  0xc0   :  { %764 = vmatprep.subr.bf16.mxu0 %v4715_v47 }
  0xc3   :  { %765 = vmatpush1.bf16.msra.mxu0 %v4713_v48 }
  0xc4   :  { %766 = vmatprep.subr.bf16.mxu0 %v4718_v49 }
  0xc7   :  { %767 = vmatpush1.bf16.msra.mxu0 %v4716_v50 }
  0xc8   :  { %768 = vmatprep.subr.bf16.mxu0 %v4721_v51 }
  0xcb   :  { %769 = vmatpush1.bf16.msra.mxu0 %v4719_v52 }
  0xcc   :  { %770 = vmatprep.subr.bf16.mxu0 %v4724_v53 }
  0xcf   :  { %771 = vmatpush1.bf16.msra.mxu0 %v4722_v54 }
  0xd0   :  { %772 = vmatprep.subr.bf16.mxu0 %v4727_v55 }
  0xd3   :  { %773 = vmatpush1.bf16.msra.mxu0 %v4725_v56  ;;  %v4839_v56 = vld [vmem:[#allocation2 + $0x400] ss:$8 sps:$4 sm:$0xff]  }
  0xd4   :  { %774 = vmatprep.subr.bf16.mxu0 %v4730_v57  ;;  %v4844_v57 = vld [vmem:[#allocation2 + $0x414] ss:$8 sps:$4 sm:$0xff]  }
  0xd7   :  { %775 = vmatpush1.bf16.msra.mxu0 %v4728_v58  ;;  %v4842_v58 = vld [vmem:[#allocation2 + $0x410] ss:$8 sps:$4 sm:$0xff]  }
  0xd8   :  { %776 = vmatprep.subr.bf16.mxu0 %v4733_v59  ;;  %v4847_v59 = vld [vmem:[#allocation2 + $0x424] ss:$8 sps:$4 sm:$0xff]  }
  0xdb   :  { %777 = vmatpush1.bf16.msra.mxu0 %v4731_v60  ;;  %v4845_v60 = vld [vmem:[#allocation2 + $0x420] ss:$8 sps:$4 sm:$0xff]  }
  0xdc   :  { %778 = vmatprep.subr.bf16.mxu0 %v4736_v61  ;;  %v4850_v61 = vld [vmem:[#allocation2 + $0x434] ss:$8 sps:$4 sm:$0xff]  }
  0xdf   :  { %779 = vmatpush1.bf16.msra.mxu0 %v4734_v62  ;;  %v4848_v62 = vld [vmem:[#allocation2 + $0x430] ss:$8 sps:$4 sm:$0xff]  }
  0xe0   :  { %780 = vmatprep.subr.bf16.mxu0 %v4739_v63  ;;  %v4853_v63 = vld [vmem:[#allocation2 + $0x444] ss:$8 sps:$4 sm:$0xff]  }
  0xe3   :  { %781 = vmatpush1.bf16.msra.mxu0 %v4737_v0  ;;  %v4851_v0 = vld [vmem:[#allocation2 + $0x440] ss:$8 sps:$4 sm:$0xff]  }
  0xe4   :  { %1692 = vmatprep.subr.bf16.mxu0 %v4748_v1  ;;  %v4856_v1 = vld [vmem:[#allocation2 + $0x454] ss:$8 sps:$4 sm:$0xff]  }
  0xe6   :  { %783 = vmatmul.mubr.bf16.vlgmr.msra.gmra.mrb[0].mxu0 %v4740_v2  ;;  %v4854_v2 = vld [vmem:[#allocation2 + $0x450] ss:$8 sps:$4 sm:$0xff]  }
  0xe7   :  { %1693 = vmatpush1.bf16.msra.mxu0 %v4746_v3  ;;  %v4859_v3 = vld [vmem:[#allocation2 + $0x464] ss:$8 sps:$4 sm:$0xff]  }
  0xe8   :  { %1694 = vmatprep.subr.bf16.mxu0 %v4754_v4  ;;  %v4857_v4 = vld [vmem:[#allocation2 + $0x460] ss:$8 sps:$4 sm:$0xff]  }
  0xeb   :  { %1695 = vmatpush1.bf16.msra.mxu0 %v4752_v5  ;;  %v4862_v5 = vld [vmem:[#allocation2 + $0x474] ss:$8 sps:$4 sm:$0xff]  }
  0xec   :  { %1696 = vmatprep.subr.bf16.mxu0 %v4760_v6  ;;  %v4860_v6 = vld [vmem:[#allocation2 + $0x470] ss:$8 sps:$4 sm:$0xff]  }
  0xef   :  { %1697 = vmatpush1.bf16.msra.mxu0 %v4758_v7  ;;  %v4865_v7 = vld [vmem:[#allocation2 + $0x484] ss:$8 sps:$4 sm:$0xff]  }
  0xf0   :  { %1698 = vmatprep.subr.bf16.mxu0 %v4766_v8  ;;  %v4863_v8 = vld [vmem:[#allocation2 + $0x480] ss:$8 sps:$4 sm:$0xff]  }
  0xf3   :  { %1699 = vmatpush1.bf16.msra.mxu0 %v4764_v9  ;;  %v4868_v9 = vld [vmem:[#allocation2 + $0x494] ss:$8 sps:$4 sm:$0xff]  }
  0xf4   :  { %1700 = vmatprep.subr.bf16.mxu0 %v4772_v10  ;;  %v4866_v10 = vld [vmem:[#allocation2 + $0x490] ss:$8 sps:$4 sm:$0xff]  }
  0xf7   :  { %1701 = vmatpush1.bf16.msra.mxu0 %v4770_v11  ;;  %v4871_v11 = vld [vmem:[#allocation2 + $0x4a4] ss:$8 sps:$4 sm:$0xff]  }
  0xf8   :  { %1702 = vmatprep.subr.bf16.mxu0 %v4778_v12  ;;  %v4869_v12 = vld [vmem:[#allocation2 + $0x4a0] ss:$8 sps:$4 sm:$0xff]  }
  0xfb   :  { %1703 = vmatpush1.bf16.msra.mxu0 %v4776_v13  ;;  %v4874_v13 = vld [vmem:[#allocation2 + $0x4b4] ss:$8 sps:$4 sm:$0xff]  }
  0xfc   :  { %1704 = vmatprep.subr.bf16.mxu0 %v4784_v14  ;;  %v4872_v14 = vld [vmem:[#allocation2 + $0x4b0] ss:$8 sps:$4 sm:$0xff]  }
  0xff   :  { %1705 = vmatpush1.bf16.msra.mxu0 %v4782_v15  ;;  %v4877_v15 = vld [vmem:[#allocation2 + $0x4c4] ss:$8 sps:$4 sm:$0xff]  }
 0x100   :  { %1706 = vmatprep.subr.bf16.mxu0 %v4790_v16  ;;  %v4875_v16 = vld [vmem:[#allocation2 + $0x4c0] ss:$8 sps:$4 sm:$0xff]  }
 0x103   :  { %1707 = vmatpush1.bf16.msra.mxu0 %v4788_v17  ;;  %v4880_v17 = vld [vmem:[#allocation2 + $0x4d4] ss:$8 sps:$4 sm:$0xff]  }
 0x104   :  { %1708 = vmatprep.subr.bf16.mxu0 %v4796_v18  ;;  %v4878_v18 = vld [vmem:[#allocation2 + $0x4d0] ss:$8 sps:$4 sm:$0xff]  }
 0x107   :  { %1709 = vmatpush1.bf16.msra.mxu0 %v4794_v19  ;;  %v4883_v19 = vld [vmem:[#allocation2 + $0x4e4] ss:$8 sps:$4 sm:$0xff]  }
 0x108   :  { %1710 = vmatprep.subr.bf16.mxu0 %v4802_v20  ;;  %v4881_v20 = vld [vmem:[#allocation2 + $0x4e0] ss:$8 sps:$4 sm:$0xff]  }
 0x10b   :  { %1711 = vmatpush1.bf16.msra.mxu0 %v4800_v21  ;;  %v4886_v21 = vld [vmem:[#allocation2 + $0x4f4] ss:$8 sps:$4 sm:$0xff]  }
 0x10c   :  { %1712 = vmatprep.subr.bf16.mxu0 %v4808_v22  ;;  %v4884_v22 = vld [vmem:[#allocation2 + $0x4f0] ss:$8 sps:$4 sm:$0xff]  }
 0x10f   :  { %1713 = vmatpush1.bf16.msra.mxu0 %v4806_v23  ;;  %v4889_v23 = vld [vmem:[#allocation2 + $0x504] ss:$8 sps:$4 sm:$0xff]  }
 0x110   :  { %1714 = vmatprep.subr.bf16.mxu0 %v4814_v24  ;;  %v4887_v24 = vld [vmem:[#allocation2 + $0x500] ss:$8 sps:$4 sm:$0xff]  }
 0x113   :  { %1715 = vmatpush1.bf16.msra.mxu0 %v4812_v25  ;;  %v4892_v25 = vld [vmem:[#allocation2 + $0x514] ss:$8 sps:$4 sm:$0xff]  }
 0x114   :  { %1716 = vmatprep.subr.bf16.mxu0 %v4820_v26  ;;  %v4890_v26 = vld [vmem:[#allocation2 + $0x510] ss:$8 sps:$4 sm:$0xff]  }
 0x117   :  { %1717 = vmatpush1.bf16.msra.mxu0 %v4818_v27  ;;  %v4895_v27 = vld [vmem:[#allocation2 + $0x524] ss:$8 sps:$4 sm:$0xff]  }
 0x118   :  { %1718 = vmatprep.subr.bf16.mxu0 %v4826_v28  ;;  %v4893_v28 = vld [vmem:[#allocation2 + $0x520] ss:$8 sps:$4 sm:$0xff]  }
 0x11b   :  { %1719 = vmatpush1.bf16.msra.mxu0 %v4824_v29  ;;  %v4898_v29 = vld [vmem:[#allocation2 + $0x534] ss:$8 sps:$4 sm:$0xff]  }
 0x11c   :  { %1720 = vmatprep.subr.bf16.mxu0 %v4832_v32  ;;  %v4899_v32 = vld [vmem:[#allocation2 + $0x540] ss:$8 sps:$4 sm:$0xff]  }
 0x11f   :  { %1721 = vmatpush1.bf16.msra.mxu0 %v4830_v33  ;;  %v4904_v33 = vld [vmem:[#allocation2 + $0x554] ss:$8 sps:$4 sm:$0xff]  }
 0x120   :  { %1722 = vmatprep.subr.bf16.mxu0 %v4838_v36  ;;  %v4905_v36 = vld [vmem:[#allocation2 + $0x560] ss:$8 sps:$4 sm:$0xff]  }
 0x123   :  { %1723 = vmatpush1.bf16.msra.mxu0 %v4836_v37  ;;  %v4910_v37 = vld [vmem:[#allocation2 + $0x574] ss:$8 sps:$4 sm:$0xff]  }
 0x1b9   :  { %v784_v45 = vpop.f32.mrb[0].mxu0 }
 0x1ba   :  { %v786_v47 = vpop.f32.mrb[1].mxu0  ;;  %v4550_v49 = vadd.f32 %v784_v45, %v147_v44  ;;  %v4914_v45 = vld [vmem:[#allocation2 + $0x590] ss:$8 sps:$4 sm:$0xff]  }
 0x1bb   :  { %v788_v48 = vpop.f32.mrb[2].mxu0  ;;  %v4551_v52 = vadd.f32 %v786_v47, %v151_v46  ;;  %v4917_v47 = vld [vmem:[#allocation2 + $0x5a0] ss:$8 sps:$4 sm:$0xff]  }
 0x1bc   :  { %v4552_v50 = vadd.f32 %v788_v48, %v147_v44  ;;  %v790_v51 = vpop.f32.mrb[3].mxu0  ;;  %v4916_v44 = vld [vmem:[#allocation2 + $0x594] ss:$8 sps:$4 sm:$0xff]  }
 0x1bd   :  { %v4553_v53 = vadd.f32 %v790_v51, %v151_v46  ;;  %v4919_v46 = vld [vmem:[#allocation2 + $0x5a4] ss:$8 sps:$4 sm:$0xff]   ;;  %v4922_v48 = vld [vmem:[#allocation2 + $0x5b4] ss:$8 sps:$4 sm:$0xff]   ;;  %v4923_v51 = vld [vmem:[#allocation2 + $0x5c0] ss:$8 sps:$4 sm:$0xff]  }
 0x1be   :  { %v5491_v54 = vpack.c.bf16 %v4552_v50, %v4550_v49  ;;  %v4920_v49 = vld [vmem:[#allocation2 + $0x5b0] ss:$8 sps:$4 sm:$0xff]   ;;  %v4925_v50 = vld [vmem:[#allocation2 + $0x5c4] ss:$8 sps:$4 sm:$0xff]  }
 0x1bf   :  { %v5493_v55 = vpack.c.bf16 %v4553_v53, %v4551_v52  ;;  %v4928_v52 = vld [vmem:[#allocation2 + $0x5d4] ss:$8 sps:$4 sm:$0xff]   ;;  %v4926_v53 = vld [vmem:[#allocation2 + $0x5d0] ss:$8 sps:$4 sm:$0xff]  }
 0x1c1   :  { %1019 = vmatprep.mubr.bf16.mxu1 %v5493_v55  ;;  %1724 = vmatprep.mubr.bf16.mxu0 %v5493_v55 }
 0x1c2   :  { %1020 = vmatmul.mubr.bf16.vlgmr.msra.gmra.mrb[0].mxu1 %v5491_v54  ;;  %1725 = vmatmul.mubr.bf16.vlgmr.msra.gmra.mrb[4].mxu0 %v5491_v54 }
 0x1c3   :  { %1223 = vmatpush1.bf16.msra.mxu1 %v4839_v56  ;;  %1254 = vmatprep.mubr.bf16.mxu1 %v5493_v55  ;;  %v4929_v56 = vld [vmem:[#allocation2 + $0x5e0] ss:$8 sps:$4 sm:$0xff]  }
 0x1c4   :  { %1224 = vmatprep.subr.bf16.mxu1 %v4844_v57  ;;  %v4934_v57 = vld [vmem:[#allocation2 + $0x5f4] ss:$8 sps:$4 sm:$0xff]  }
 0x1c7   :  { %1225 = vmatpush1.bf16.msra.mxu1 %v4842_v58  ;;  %v4932_v58 = vld [vmem:[#allocation2 + $0x5f0] ss:$8 sps:$4 sm:$0xff]  }
 0x1c8   :  { %1226 = vmatprep.subr.bf16.mxu1 %v4847_v59  ;;  %v4937_v59 = vld [vmem:[#allocation2 + $0x704] ss:$8 sps:$4 sm:$0xff]  }
 0x1cb   :  { %1227 = vmatpush1.bf16.msra.mxu1 %v4845_v60  ;;  %v4935_v60 = vld [vmem:[#allocation2 + $0x700] ss:$8 sps:$4 sm:$0xff]  }
 0x1cc   :  { %1228 = vmatprep.subr.bf16.mxu1 %v4850_v61  ;;  %v4940_v61 = vld [vmem:[#allocation2 + $0x714] ss:$8 sps:$4 sm:$0xff]  }
 0x1cf   :  { %1229 = vmatpush1.bf16.msra.mxu1 %v4848_v62  ;;  %v4938_v62 = vld [vmem:[#allocation2 + $0x710] ss:$8 sps:$4 sm:$0xff]  }
 0x1d0   :  { %1230 = vmatprep.subr.bf16.mxu1 %v4853_v63  ;;  %v4943_v63 = vld [vmem:[#allocation2 + $0x724] ss:$8 sps:$4 sm:$0xff]  }
 0x1d3   :  { %1231 = vmatpush1.bf16.msra.mxu1 %v4851_v0  ;;  %v4941_v0 = vld [vmem:[#allocation2 + $0x720] ss:$8 sps:$4 sm:$0xff]  }
 0x1d4   :  { %1232 = vmatprep.subr.bf16.mxu1 %v4856_v1  ;;  %v4946_v1 = vld [vmem:[#allocation2 + $0x734] ss:$8 sps:$4 sm:$0xff]  }
 0x1d7   :  { %1233 = vmatpush1.bf16.msra.mxu1 %v4854_v2  ;;  %v4944_v2 = vld [vmem:[#allocation2 + $0x730] ss:$8 sps:$4 sm:$0xff]  }
 0x1d8   :  { %1234 = vmatprep.subr.bf16.mxu1 %v4859_v3  ;;  %v4949_v3 = vld [vmem:[#allocation2 + $0x744] ss:$8 sps:$4 sm:$0xff]  }
 0x1db   :  { %1235 = vmatpush1.bf16.msra.mxu1 %v4857_v4  ;;  %v4947_v4 = vld [vmem:[#allocation2 + $0x740] ss:$8 sps:$4 sm:$0xff]  }
 0x1dc   :  { %1236 = vmatprep.subr.bf16.mxu1 %v4862_v5  ;;  %v4952_v5 = vld [vmem:[#allocation2 + $0x754] ss:$8 sps:$4 sm:$0xff]  }
 0x1df   :  { %1237 = vmatpush1.bf16.msra.mxu1 %v4860_v6  ;;  %v4950_v6 = vld [vmem:[#allocation2 + $0x750] ss:$8 sps:$4 sm:$0xff]  }
 0x1e0   :  { %1238 = vmatprep.subr.bf16.mxu1 %v4865_v7  ;;  %v4953_v7 = vld [vmem:[#allocation2 + $0x760] ss:$8 sps:$4 sm:$0xff]  }
 0x1e3   :  { %1239 = vmatpush1.bf16.msra.mxu1 %v4863_v8  ;;  %v4958_v8 = vld [vmem:[#allocation2 + $0x774] ss:$8 sps:$4 sm:$0xff]  }
 0x1e4   :  { %1240 = vmatprep.subr.bf16.mxu1 %v4868_v9  ;;  %v4956_v9 = vld [vmem:[#allocation2 + $0x770] ss:$8 sps:$4 sm:$0xff]  }
 0x1e7   :  { %1241 = vmatpush1.bf16.msra.mxu1 %v4866_v10  ;;  %v4961_v10 = vld [vmem:[#allocation2 + $0x784] ss:$8 sps:$4 sm:$0xff]  }
 0x1e8   :  { %1242 = vmatprep.subr.bf16.mxu1 %v4871_v11  ;;  %v4959_v11 = vld [vmem:[#allocation2 + $0x780] ss:$8 sps:$4 sm:$0xff]  }
 0x1eb   :  { %1243 = vmatpush1.bf16.msra.mxu1 %v4869_v12  ;;  %v4964_v12 = vld [vmem:[#allocation2 + $0x794] ss:$8 sps:$4 sm:$0xff]  }
 0x1ec   :  { %1244 = vmatprep.subr.bf16.mxu1 %v4874_v13  ;;  %v4962_v13 = vld [vmem:[#allocation2 + $0x790] ss:$8 sps:$4 sm:$0xff]  }
 0x1ef   :  { %1245 = vmatpush1.bf16.msra.mxu1 %v4872_v14  ;;  %v4967_v14 = vld [vmem:[#allocation2 + $0x7a4] ss:$8 sps:$4 sm:$0xff]  }
 0x1f0   :  { %1246 = vmatprep.subr.bf16.mxu1 %v4877_v15  ;;  %v4965_v15 = vld [vmem:[#allocation2 + $0x7a0] ss:$8 sps:$4 sm:$0xff]  }
 0x1f3   :  { %1247 = vmatpush1.bf16.msra.mxu1 %v4875_v16  ;;  %v4970_v16 = vld [vmem:[#allocation2 + $0x7b4] ss:$8 sps:$4 sm:$0xff]  }
 0x1f4   :  { %1248 = vmatprep.subr.bf16.mxu1 %v4880_v17  ;;  %v4968_v17 = vld [vmem:[#allocation2 + $0x7b0] ss:$8 sps:$4 sm:$0xff]  }
 0x1f7   :  { %1249 = vmatpush1.bf16.msra.mxu1 %v4878_v18  ;;  %v4973_v18 = vld [vmem:[#allocation2 + $0x7c4] ss:$8 sps:$4 sm:$0xff]  }
 0x1f8   :  { %1250 = vmatprep.subr.bf16.mxu1 %v4883_v19  ;;  %v4971_v19 = vld [vmem:[#allocation2 + $0x7c0] ss:$8 sps:$4 sm:$0xff]  }
 0x1fb   :  { %1251 = vmatpush1.bf16.msra.mxu1 %v4881_v20  ;;  %v4976_v20 = vld [vmem:[#allocation2 + $0x7d4] ss:$8 sps:$4 sm:$0xff]  }
 0x1fc   :  { %1252 = vmatprep.subr.bf16.mxu1 %v4886_v21  ;;  %v4974_v21 = vld [vmem:[#allocation2 + $0x7d0] ss:$8 sps:$4 sm:$0xff]  }
 0x1ff   :  { %1253 = vmatpush1.bf16.msra.mxu1 %v4884_v22  ;;  %v4979_v22 = vld [vmem:[#allocation2 + $0x7e4] ss:$8 sps:$4 sm:$0xff]  }
 0x200   :  { %1457 = vmatprep.subr.bf16.mxu1 %v4889_v23  ;;  %v4977_v23 = vld [vmem:[#allocation2 + $0x7e0] ss:$8 sps:$4 sm:$0xff]  }
 0x202   :  { %1255 = vmatmul.mubr.bf16.vlgmr.msra.gmra.mrb[4].mxu1 %v5491_v54 }
 0x203   :  { %1458 = vmatpush1.bf16.msra.mxu1 %v4887_v24  ;;  %1489 = vmatprep.mubr.bf16.mxu1 %v5493_v55  ;;  %v4931_v55 = vld [vmem:[#allocation2 + $0x5e4] ss:$8 sps:$4 sm:$0xff]   ;;  %v4982_v24 = vld [vmem:[#allocation2 + $0x7f4] ss:$8 sps:$4 sm:$0xff]  }
 0x204   :  { %1459 = vmatprep.subr.bf16.mxu1 %v4892_v25  ;;  %v4980_v25 = vld [vmem:[#allocation2 + $0x7f0] ss:$8 sps:$4 sm:$0xff]  }
 0x207   :  { %1460 = vmatpush1.bf16.msra.mxu1 %v4890_v26  ;;  %v4985_v26 = vld [vmem:[#allocation2 + $0x804] ss:$8 sps:$4 sm:$0xff]  }
 0x208   :  { %1461 = vmatprep.subr.bf16.mxu1 %v4895_v27  ;;  %v1763_v27 = vsub.s32 6, %v5481_v40 }
 0x20b   :  { %1462 = vmatpush1.bf16.msra.mxu1 %v4893_v28  ;;  %v5504_v28 = vld [vmem:[#allocation4 + $0x2] sm:$0xff] }
 0x20c   :  { %1463 = vmatprep.subr.bf16.mxu1 %v4898_v29  ;;  %v1767_v29 = vsub.s32 7, %v5481_v40 }
 0x20f   :  { %1464 = vmatpush1.bf16.msra.mxu1 %v4896_v30  ;;  %v1740_v30 = vrot.slane %v5504_v28, %v5484_v41 }
 0x210   :  { %1465 = vmatprep.subr.bf16.mxu1 %v4901_v31  ;;  %v1764_v31 = vrot.slane %v5504_v28, %v1763_v27  ;;  %v1747_v27 = vsub.s32 2, %v5481_v40 }
 0x213   :  { %1466 = vmatpush1.bf16.msra.mxu1 %v4899_v32  ;;  %v1744_v32 = vrot.slane %v5504_v28, %v5487_v43 }
 0x214   :  { %1467 = vmatprep.subr.bf16.mxu1 %v4904_v33  ;;  %v1768_v33 = vrot.slane %v5504_v28, %v1767_v29  ;;  %v1751_v29 = vsub.s32 3, %v5481_v40 }
 0x217   :  { %1468 = vmatpush1.bf16.msra.mxu1 %v4902_v34 }
 0x218   :  { %1469 = vmatprep.subr.bf16.mxu1 %v4907_v35 }
 0x21b   :  { %1470 = vmatpush1.bf16.msra.mxu1 %v4905_v36 }
 0x21c   :  { %1471 = vmatprep.subr.bf16.mxu1 %v4910_v37 }
 0x21f   :  { %1472 = vmatpush1.bf16.msra.mxu1 %v4908_v38 }
 0x220   :  { %1473 = vmatprep.subr.bf16.mxu1 %v4913_v39 }
 0x223   :  { %1474 = vmatpush1.bf16.msra.mxu1 %v4911_v42 }
 0x224   :  { %1475 = vmatprep.subr.bf16.mxu1 %v4916_v44 }
 0x227   :  { %1476 = vmatpush1.bf16.msra.mxu1 %v4914_v45 }
 0x228   :  { %1477 = vmatprep.subr.bf16.mxu1 %v4919_v46 }
 0x22b   :  { %1478 = vmatpush1.bf16.msra.mxu1 %v4917_v47 }
 0x22c   :  { %1479 = vmatprep.subr.bf16.mxu1 %v4922_v48 }
 0x22f   :  { %1480 = vmatpush1.bf16.msra.mxu1 %v4920_v49 }
 0x230   :  { %1481 = vmatprep.subr.bf16.mxu1 %v4925_v50 }
 0x233   :  { %1482 = vmatpush1.bf16.msra.mxu1 %v4923_v51 }
 0x234   :  { %1483 = vmatprep.subr.bf16.mxu1 %v4928_v52 }
 0x237   :  { %1484 = vmatpush1.bf16.msra.mxu1 %v4926_v53 }
 0x238   :  { %1485 = vmatprep.subr.bf16.mxu1 %v4931_v55 }
 0x23b   :  { %1486 = vmatpush1.bf16.msra.mxu1 %v4929_v56 }
 0x23c   :  { %1487 = vmatprep.subr.bf16.mxu1 %v4934_v57 }
 0x23f   :  { %1488 = vmatpush1.bf16.msra.mxu1 %v4932_v58 }
 0x240   :  { %2597 = vmatprep.subr.bf16.mxu1 %v4937_v59 }
 0x242   :  { %1490 = vmatmul.mubr.bf16.vlgmr.msra.gmra.mrb[8].mxu1 %v5491_v54  ;;  %v4955_v54 = vld [vmem:[#allocation2 + $0x764] ss:$8 sps:$4 sm:$0xff]  }
 0x243   :  { %2598 = vmatpush1.bf16.msra.mxu1 %v4935_v60 }
 0x244   :  { %2599 = vmatprep.subr.bf16.mxu1 %v4940_v61 }
 0x247   :  { %2600 = vmatpush1.bf16.msra.mxu1 %v4938_v62 }
 0x248   :  { %2601 = vmatprep.subr.bf16.mxu1 %v4943_v63 }
 0x24b   :  { %2602 = vmatpush1.bf16.msra.mxu1 %v4941_v0 }
 0x24c   :  { %2603 = vmatprep.subr.bf16.mxu1 %v4946_v1 }
 0x24f   :  { %2604 = vmatpush1.bf16.msra.mxu1 %v4944_v2  ;;  %v4983_v2 = vld [vmem:[#allocation2 + $0x800] ss:$8 sps:$4 sm:$0xff]  }
 0x250   :  { %2605 = vmatprep.subr.bf16.mxu1 %v4949_v3  ;;  %v4988_v3 = vld [vmem:[#allocation2 + $0x814] ss:$8 sps:$4 sm:$0xff]  }
 0x253   :  { %2606 = vmatpush1.bf16.msra.mxu1 %v4947_v4  ;;  %v4986_v4 = vld [vmem:[#allocation2 + $0x810] ss:$8 sps:$4 sm:$0xff]  }
 0x254   :  { %2607 = vmatprep.subr.bf16.mxu1 %v4952_v5  ;;  %v4991_v5 = vld [vmem:[#allocation2 + $0x824] ss:$8 sps:$4 sm:$0xff]  }
 0x257   :  { %2608 = vmatpush1.bf16.msra.mxu1 %v4950_v6  ;;  %v4989_v6 = vld [vmem:[#allocation2 + $0x820] ss:$8 sps:$4 sm:$0xff]  }
 0x258   :  { %2609 = vmatprep.subr.bf16.mxu1 %v4955_v54  ;;  %v4994_v54 = vld [vmem:[#allocation2 + $0x834] ss:$8 sps:$4 sm:$0xff]  }
 0x25b   :  { %2610 = vmatpush1.bf16.msra.mxu1 %v4953_v7  ;;  %v4992_v7 = vld [vmem:[#allocation2 + $0x830] ss:$8 sps:$4 sm:$0xff]  }
 0x25c   :  { %2611 = vmatprep.subr.bf16.mxu1 %v4958_v8  ;;  %v4997_v8 = vld [vmem:[#allocation2 + $0x844] ss:$8 sps:$4 sm:$0xff]  }
 0x25f   :  { %2612 = vmatpush1.bf16.msra.mxu1 %v4956_v9  ;;  %v4995_v9 = vld [vmem:[#allocation2 + $0x840] ss:$8 sps:$4 sm:$0xff]  }
 0x260   :  { %2613 = vmatprep.subr.bf16.mxu1 %v4961_v10  ;;  %v5000_v10 = vld [vmem:[#allocation2 + $0x854] ss:$8 sps:$4 sm:$0xff]  }
 0x263   :  { %2614 = vmatpush1.bf16.msra.mxu1 %v4959_v11  ;;  %v4998_v11 = vld [vmem:[#allocation2 + $0x850] ss:$8 sps:$4 sm:$0xff]  }
 0x264   :  { %2615 = vmatprep.subr.bf16.mxu1 %v4964_v12  ;;  %v5003_v12 = vld [vmem:[#allocation2 + $0x864] ss:$8 sps:$4 sm:$0xff]  }
 0x267   :  { %2616 = vmatpush1.bf16.msra.mxu1 %v4962_v13  ;;  %v5001_v13 = vld [vmem:[#allocation2 + $0x860] ss:$8 sps:$4 sm:$0xff]  }
 0x268   :  { %2617 = vmatprep.subr.bf16.mxu1 %v4967_v14  ;;  %v5006_v14 = vld [vmem:[#allocation2 + $0x874] ss:$8 sps:$4 sm:$0xff]  }
 0x26b   :  { %2618 = vmatpush1.bf16.msra.mxu1 %v4965_v15  ;;  %v5004_v15 = vld [vmem:[#allocation2 + $0x870] ss:$8 sps:$4 sm:$0xff]  }
 0x26c   :  { %2619 = vmatprep.subr.bf16.mxu1 %v4970_v16  ;;  %v5009_v16 = vld [vmem:[#allocation2 + $0x884] ss:$8 sps:$4 sm:$0xff]  }
 0x26f   :  { %2620 = vmatpush1.bf16.msra.mxu1 %v4968_v17  ;;  %v5007_v17 = vld [vmem:[#allocation2 + $0x880] ss:$8 sps:$4 sm:$0xff]  }
 0x270   :  { %2621 = vmatprep.subr.bf16.mxu1 %v4973_v18  ;;  %v5012_v18 = vld [vmem:[#allocation2 + $0x894] ss:$8 sps:$4 sm:$0xff]  }
 0x273   :  { %2622 = vmatpush1.bf16.msra.mxu1 %v4971_v19  ;;  %v5010_v19 = vld [vmem:[#allocation2 + $0x890] ss:$8 sps:$4 sm:$0xff]  }
 0x274   :  { %2623 = vmatprep.subr.bf16.mxu1 %v4976_v20  ;;  %v5015_v20 = vld [vmem:[#allocation2 + $0x8a4] ss:$8 sps:$4 sm:$0xff]  }
 0x277   :  { %2624 = vmatpush1.bf16.msra.mxu1 %v4974_v21  ;;  %v5013_v21 = vld [vmem:[#allocation2 + $0x8a0] ss:$8 sps:$4 sm:$0xff]  }
 0x278   :  { %2625 = vmatprep.subr.bf16.mxu1 %v4979_v22  ;;  %v5018_v22 = vld [vmem:[#allocation2 + $0x8b4] ss:$8 sps:$4 sm:$0xff]  }
 0x27b   :  { %2626 = vmatpush1.bf16.msra.mxu1 %v4977_v23  ;;  %v5016_v23 = vld [vmem:[#allocation2 + $0x8b0] ss:$8 sps:$4 sm:$0xff]  }
 0x27c   :  { %2627 = vmatprep.subr.bf16.mxu1 %v4982_v24  ;;  %v5021_v24 = vld [vmem:[#allocation2 + $0x8c4] ss:$8 sps:$4 sm:$0xff]  }
 0x27f   :  { %2628 = vmatpush1.bf16.msra.mxu1 %v4980_v25  ;;  %v5019_v25 = vld [vmem:[#allocation2 + $0x8c0] ss:$8 sps:$4 sm:$0xff]  }
 0x280   :  { %2640 = vmatprep.subr.bf16.mxu1 %v4985_v26  ;;  %v5024_v26 = vld [vmem:[#allocation2 + $0x8d4] ss:$8 sps:$4 sm:$0xff]  }
 0x295   :  { %v1021_v34 = vpop.f32.mrb[0].mxu1  ;;  %v1726_v35 = vpop.f32.mrb[4].mxu0 }
 0x296   :  { %v1777_v36 = vadd.f32 %v1740_v30, %v1021_v34  ;;  %v1783_v37 = vadd.f32 %v1764_v31, %v1726_v35  ;;  %v1023_v38 = vpop.f32.mrb[1].mxu1  ;;  %v1728_v39 = vpop.f32.mrb[5].mxu0  ;;  %v5025_v35 = vld [vmem:[#allocation2 + $0x8e0] ss:$8 sps:$4 sm:$0xff]  }
 0x297   :  { %v1778_v42 = vadd.f32 %v1744_v32, %v1023_v38  ;;  %v1784_v44 = vadd.f32 %v1768_v33, %v1728_v39  ;;  %v1025_v45 = vpop.f32.mrb[2].mxu1  ;;  %v1730_v46 = vpop.f32.mrb[6].mxu0  ;;  %v5030_v38 = vld [vmem:[#allocation2 + $0x8f4] ss:$8 sps:$4 sm:$0xff]  }
 0x298   :  { %v1785_v47 = vadd.f32 %v1740_v30, %v1025_v45  ;;  %v1791_v48 = vadd.f32 %v1764_v31, %v1730_v46  ;;  %v1027_v49 = vpop.f32.mrb[3].mxu1  ;;  %v1732_v50 = vpop.f32.mrb[7].mxu0  ;;  %v1793_v53 = vmax.f32 %v1777_v36, 0.0  ;;  %v1799_v55 = vmax.f32 %v1783_v37, 0.0  ;;  %v5022_v30 = vld [vmem:[#allocation2 + $0x8d0] ss:$8 sps:$4 sm:$0xff]  }
 0x299   :  { %v1786_v51 = vadd.f32 %v1744_v32, %v1027_v49  ;;  %v1792_v52 = vadd.f32 %v1768_v33, %v1732_v50  ;;  %v1794_v58 = vmax.f32 %v1778_v42, 0.0  ;;  %v1800_v59 = vmax.f32 %v1784_v44, 0.0  ;;  %v5027_v32 = vld [vmem:[#allocation2 + $0x8e4] ss:$8 sps:$4 sm:$0xff]  }
 0x29a   :  { %v1801_v56 = vmax.f32 %v1785_v47, 0.0  ;;  %v1807_v57 = vmax.f32 %v1791_v48, 0.0  ;;  %v1748_v31 = vrot.slane %v5504_v28, %v1747_v27  ;;  %v1752_v33 = vrot.slane %v5504_v28, %v1751_v29  ;;  %v5028_v47 = vld [vmem:[#allocation2 + $0x8f0] ss:$8 sps:$4 sm:$0xff]   ;;  %v5033_v50 = vld [vmem:[#allocation2 + $0x904] ss:$8 sps:$4 sm:$0xff]  }
 0x29b   :  { %v1802_v60 = vmax.f32 %v1786_v51, 0.0  ;;  %v1808_v61 = vmax.f32 %v1792_v52, 0.0 }
 0x29c   :  { %v1809_v62 = vpack.c.bf16 %v1801_v56, %v1793_v53  ;;  %v5513_v63 = vpack.c.bf16 %v1807_v57, %v1799_v55  ;;  %v5031_v56 = vld [vmem:[#allocation2 + $0x900] ss:$8 sps:$4 sm:$0xff]   ;;  %v5036_v57 = vld [vmem:[#allocation2 + $0x914] ss:$8 sps:$4 sm:$0xff]  }
 0x29d   :  { %v1810_v0 = vpack.c.bf16 %v1802_v60, %v1794_v58  ;;  %v5515_v1 = vpack.c.bf16 %v1808_v61, %v1800_v59  ;;  %v5127_v58 = vld [vmem:[#allocation2 + $0xb00] ss:$8 sps:$4 sm:$0xff]   ;;  %v5129_v59 = vld [vmem:[#allocation2 + $0xb04] ss:$8 sps:$4 sm:$0xff]   ;;  %v5034_v60 = vld [vmem:[#allocation2 + $0x910] ss:$8 sps:$4 sm:$0xff]  }
 0x29e   :  { %v5132_v61 = vld [vmem:[#allocation2 + $0xb14] ss:$8 sps:$4 sm:$0xff]   ;;  %2967 = vmatprep.subr.bf16.mxu0 %v5129_v59  ;;  %v5166_v59 = vld [vmem:[#allocation2 + $0xbd0] ss:$8 sps:$4 sm:$0xff]  }
 0x29f   :  { %2629 = vmatprep.mubr.bf16.mxu1 %v1810_v0  ;;  %2968 = vmatpush1.bf16.msra.mxu0 %v5127_v58  ;;  %v5130_v0 = vld [vmem:[#allocation2 + $0xb10] ss:$8 sps:$4 sm:$0xff]  }
 0x2a0   :  { %2630 = vmatmul.mubr.bf16.vlgmr.msra.gmra.mrb[12].mxu1 %v1809_v62  ;;  %v5039_v62 = vld [vmem:[#allocation2 + $0x924] ss:$8 sps:$4 sm:$0xff]   ;;  %2969 = vmatprep.subr.bf16.mxu0 %v5132_v61  ;;  %v5073_v61 = vld [vmem:[#allocation2 + $0x9e0] ss:$8 sps:$4 sm:$0xff]  }
 0x2a1   :  { %2641 = vmatpush1.bf16.msra.mxu1 %v4983_v2  ;;  %v5135_v2 = vld [vmem:[#allocation2 + $0xb24] ss:$8 sps:$4 sm:$0xff]  }
 0x2a2   :  { %2642 = vmatprep.subr.bf16.mxu1 %v4988_v3  ;;  %v5037_v3 = vld [vmem:[#allocation2 + $0x920] ss:$8 sps:$4 sm:$0xff]  }
 0x2a3   :  { %2970 = vmatpush1.bf16.msra.mxu0 %v5130_v0 }
 0x2a4   :  { %2971 = vmatprep.subr.bf16.mxu0 %v5135_v2  ;;  %v5078_v2 = vld [vmem:[#allocation2 + $0x9f4] ss:$8 sps:$4 sm:$0xff]  }
 0x2a5   :  { %2643 = vmatpush1.bf16.msra.mxu1 %v4986_v4  ;;  %v5042_v4 = vld [vmem:[#allocation2 + $0x934] ss:$8 sps:$4 sm:$0xff]  }
 0x2a6   :  { %2644 = vmatprep.subr.bf16.mxu1 %v4991_v5  ;;  %v5133_v5 = vld [vmem:[#allocation2 + $0xb20] ss:$8 sps:$4 sm:$0xff]  }
 0x2a7   :  { %2972 = vmatpush1.bf16.msra.mxu0 %v5133_v5 }
 0x2a9   :  { %2645 = vmatpush1.bf16.msra.mxu1 %v4989_v6  ;;  %v5138_v6 = vld [vmem:[#allocation2 + $0xb34] ss:$8 sps:$4 sm:$0xff]  }
 0x2aa   :  { %2646 = vmatprep.subr.bf16.mxu1 %v4994_v54  ;;  %v5040_v54 = vld [vmem:[#allocation2 + $0x930] ss:$8 sps:$4 sm:$0xff]   ;;  %2973 = vmatprep.subr.bf16.mxu0 %v5138_v6 }
 0x2ad   :  { %2647 = vmatpush1.bf16.msra.mxu1 %v4992_v7  ;;  %v5045_v7 = vld [vmem:[#allocation2 + $0x944] ss:$8 sps:$4 sm:$0xff]  }
 0x2ae   :  { %2648 = vmatprep.subr.bf16.mxu1 %v4997_v8  ;;  %v5136_v8 = vld [vmem:[#allocation2 + $0xb30] ss:$8 sps:$4 sm:$0xff]  }
 0x2af   :  { %2974 = vmatpush1.bf16.msra.mxu0 %v5136_v8 }
 0x2b1   :  { %2649 = vmatpush1.bf16.msra.mxu1 %v4995_v9  ;;  %v5141_v9 = vld [vmem:[#allocation2 + $0xb44] ss:$8 sps:$4 sm:$0xff]  }
 0x2b2   :  { %2650 = vmatprep.subr.bf16.mxu1 %v5000_v10  ;;  %v5043_v10 = vld [vmem:[#allocation2 + $0x940] ss:$8 sps:$4 sm:$0xff]   ;;  %2975 = vmatprep.subr.bf16.mxu0 %v5141_v9  ;;  %v5081_v9 = vld [vmem:[#allocation2 + $0xa04] ss:$8 sps:$4 sm:$0xff]  }
 0x2b5   :  { %2651 = vmatpush1.bf16.msra.mxu1 %v4998_v11  ;;  %v5048_v11 = vld [vmem:[#allocation2 + $0x954] ss:$8 sps:$4 sm:$0xff]  }
 0x2b6   :  { %2652 = vmatprep.subr.bf16.mxu1 %v5003_v12  ;;  %v5139_v12 = vld [vmem:[#allocation2 + $0xb40] ss:$8 sps:$4 sm:$0xff]  }
 0x2b7   :  { %2976 = vmatpush1.bf16.msra.mxu0 %v5139_v12 }
 0x2b9   :  { %2653 = vmatpush1.bf16.msra.mxu1 %v5001_v13  ;;  %v5144_v13 = vld [vmem:[#allocation2 + $0xb54] ss:$8 sps:$4 sm:$0xff]  }
 0x2ba   :  { %2654 = vmatprep.subr.bf16.mxu1 %v5006_v14  ;;  %v5046_v14 = vld [vmem:[#allocation2 + $0x950] ss:$8 sps:$4 sm:$0xff]   ;;  %2977 = vmatprep.subr.bf16.mxu0 %v5144_v13 }
 0x2bd   :  { %2655 = vmatpush1.bf16.msra.mxu1 %v5004_v15  ;;  %v5051_v15 = vld [vmem:[#allocation2 + $0x964] ss:$8 sps:$4 sm:$0xff]  }
 0x2be   :  { %2656 = vmatprep.subr.bf16.mxu1 %v5009_v16  ;;  %v5142_v16 = vld [vmem:[#allocation2 + $0xb50] ss:$8 sps:$4 sm:$0xff]  }
 0x2bf   :  { %2978 = vmatpush1.bf16.msra.mxu0 %v5142_v16  ;;  %v5082_v16 = vld [vmem:[#allocation2 + $0xa10] ss:$8 sps:$4 sm:$0xff]  }
 0x2c1   :  { %2657 = vmatpush1.bf16.msra.mxu1 %v5007_v17  ;;  %v5147_v17 = vld [vmem:[#allocation2 + $0xb64] ss:$8 sps:$4 sm:$0xff]  }
 0x2c2   :  { %2658 = vmatprep.subr.bf16.mxu1 %v5012_v18  ;;  %v5049_v18 = vld [vmem:[#allocation2 + $0x960] ss:$8 sps:$4 sm:$0xff]   ;;  %2979 = vmatprep.subr.bf16.mxu0 %v5147_v17  ;;  %v5087_v17 = vld [vmem:[#allocation2 + $0xa24] ss:$8 sps:$4 sm:$0xff]  }
 0x2c5   :  { %2659 = vmatpush1.bf16.msra.mxu1 %v5010_v19  ;;  %v5054_v19 = vld [vmem:[#allocation2 + $0x974] ss:$8 sps:$4 sm:$0xff]  }
 0x2c6   :  { %2660 = vmatprep.subr.bf16.mxu1 %v5015_v20  ;;  %v5145_v20 = vld [vmem:[#allocation2 + $0xb60] ss:$8 sps:$4 sm:$0xff]  }
 0x2c7   :  { %2980 = vmatpush1.bf16.msra.mxu0 %v5145_v20  ;;  %v5088_v20 = vld [vmem:[#allocation2 + $0xa30] ss:$8 sps:$4 sm:$0xff]  }
 0x2c9   :  { %2661 = vmatpush1.bf16.msra.mxu1 %v5013_v21  ;;  %v5150_v21 = vld [vmem:[#allocation2 + $0xb74] ss:$8 sps:$4 sm:$0xff]  }
 0x2ca   :  { %2662 = vmatprep.subr.bf16.mxu1 %v5018_v22  ;;  %v5052_v22 = vld [vmem:[#allocation2 + $0x970] ss:$8 sps:$4 sm:$0xff]   ;;  %2981 = vmatprep.subr.bf16.mxu0 %v5150_v21  ;;  %v5093_v21 = vld [vmem:[#allocation2 + $0xa44] ss:$8 sps:$4 sm:$0xff]  }
 0x2cd   :  { %2663 = vmatpush1.bf16.msra.mxu1 %v5016_v23  ;;  %v5057_v23 = vld [vmem:[#allocation2 + $0x984] ss:$8 sps:$4 sm:$0xff]  }
 0x2ce   :  { %2664 = vmatprep.subr.bf16.mxu1 %v5021_v24  ;;  %v5148_v24 = vld [vmem:[#allocation2 + $0xb70] ss:$8 sps:$4 sm:$0xff]  }
 0x2cf   :  { %2982 = vmatpush1.bf16.msra.mxu0 %v5148_v24  ;;  %v5094_v24 = vld [vmem:[#allocation2 + $0xa50] ss:$8 sps:$4 sm:$0xff]  }
 0x2d1   :  { %2665 = vmatpush1.bf16.msra.mxu1 %v5019_v25  ;;  %v5153_v25 = vld [vmem:[#allocation2 + $0xb84] ss:$8 sps:$4 sm:$0xff]  }
 0x2d2   :  { %2666 = vmatprep.subr.bf16.mxu1 %v5024_v26  ;;  %v5055_v26 = vld [vmem:[#allocation2 + $0x980] ss:$8 sps:$4 sm:$0xff]   ;;  %2983 = vmatprep.subr.bf16.mxu0 %v5153_v25  ;;  %v5099_v25 = vld [vmem:[#allocation2 + $0xa64] ss:$8 sps:$4 sm:$0xff]  }
 0x2d5   :  { %v1256_v34 = vpop.f32.mrb[4].mxu1  ;;  %2667 = vmatpush1.bf16.msra.mxu1 %v5022_v30  ;;  %v5060_v30 = vld [vmem:[#allocation2 + $0x994] ss:$8 sps:$4 sm:$0xff]  }
 0x2d6   :  { %v1779_v36 = vadd.f32 %v1748_v31, %v1256_v34  ;;  %v1258_v37 = vpop.f32.mrb[5].mxu1  ;;  %2668 = vmatprep.subr.bf16.mxu1 %v5027_v32  ;;  %v5156_v32 = vld [vmem:[#allocation2 + $0xb94] ss:$8 sps:$4 sm:$0xff]   ;;  %v5063_v34 = vld [vmem:[#allocation2 + $0x9a4] ss:$8 sps:$4 sm:$0xff]  }
 0x2d7   :  { %v1780_v39 = vadd.f32 %v1752_v33, %v1258_v37  ;;  %v1260_v42 = vpop.f32.mrb[6].mxu1  ;;  %v5061_v37 = vld [vmem:[#allocation2 + $0x9a0] ss:$8 sps:$4 sm:$0xff]  }
 0x2d8   :  { %v1787_v44 = vadd.f32 %v1748_v31, %v1260_v42  ;;  %v1262_v45 = vpop.f32.mrb[7].mxu1  ;;  %v1795_v48 = vmax.f32 %v1779_v36, 0.0  ;;  %v5151_v31 = vld [vmem:[#allocation2 + $0xb80] ss:$8 sps:$4 sm:$0xff]   ;;  %v5159_v36 = vld [vmem:[#allocation2 + $0xba4] ss:$8 sps:$4 sm:$0xff]  }
 0x2d9   :  { %v1788_v46 = vadd.f32 %v1752_v33, %v1262_v45  ;;  %2669 = vmatpush1.bf16.msra.mxu1 %v5025_v35  ;;  %v1796_v51 = vmax.f32 %v1780_v39, 0.0  ;;  %v5058_v33 = vld [vmem:[#allocation2 + $0x990] ss:$8 sps:$4 sm:$0xff]   ;;  %2984 = vmatpush1.bf16.msra.mxu0 %v5151_v31  ;;  %v5157_v39 = vld [vmem:[#allocation2 + $0xba0] ss:$8 sps:$4 sm:$0xff]  }
 0x2da   :  { %v1803_v49 = vmax.f32 %v1787_v44, 0.0  ;;  %2670 = vmatprep.subr.bf16.mxu1 %v5030_v38  ;;  %v5154_v35 = vld [vmem:[#allocation2 + $0xb90] ss:$8 sps:$4 sm:$0xff]   ;;  %2985 = vmatprep.subr.bf16.mxu0 %v5156_v32  ;;  %v5066_v38 = vld [vmem:[#allocation2 + $0x9b4] ss:$8 sps:$4 sm:$0xff]  }
 0x2db   :  { %v1804_v52 = vmax.f32 %v1788_v46, 0.0  ;;  %v5162_v42 = vld [vmem:[#allocation2 + $0xbb4] ss:$8 sps:$4 sm:$0xff]   ;;  %v5064_v44 = vld [vmem:[#allocation2 + $0x9b0] ss:$8 sps:$4 sm:$0xff]  }
 0x2dc   :  { %v1811_v53 = vpack.c.bf16 %v1803_v49, %v1795_v48  ;;  %v5069_v45 = vld [vmem:[#allocation2 + $0x9c4] ss:$8 sps:$4 sm:$0xff]   ;;  %v5160_v46 = vld [vmem:[#allocation2 + $0xbb0] ss:$8 sps:$4 sm:$0xff]   ;;  %v5067_v48 = vld [vmem:[#allocation2 + $0x9c0] ss:$8 sps:$4 sm:$0xff]  }
 0x2dd   :  { %v1812_v55 = vpack.c.bf16 %v1804_v52, %v1796_v51  ;;  %2671 = vmatpush1.bf16.msra.mxu1 %v5028_v47  ;;  %2986 = vmatpush1.bf16.msra.mxu0 %v5154_v35  ;;  %v5165_v47 = vld [vmem:[#allocation2 + $0xbc4] ss:$8 sps:$4 sm:$0xff]   ;;  %v5072_v49 = vld [vmem:[#allocation2 + $0x9d4] ss:$8 sps:$4 sm:$0xff]   ;;  %v1759_v51 = vsub.s32 5, %v5481_v40 }
 0x2de   :  { %2683 = vmatprep.subr.bf16.mxu1 %v5033_v50  ;;  %2987 = vmatprep.subr.bf16.mxu0 %v5159_v36  ;;  %v1755_v50 = vsub.s32 4, %v5481_v40  ;;  %v5163_v52 = vld [vmem:[#allocation2 + $0xbc0] ss:$8 sps:$4 sm:$0xff]   ;;  %v5105_v31 = vld [vmem:[#allocation2 + $0xa84] ss:$8 sps:$4 sm:$0xff]  }
 0x2df   :  { %2672 = vmatprep.mubr.bf16.mxu1 %v1812_v55  ;;  %v5070_v55 = vld [vmem:[#allocation2 + $0x9d0] ss:$8 sps:$4 sm:$0xff]   ;;  %v1760_v58 = vrot.slane %v5504_v28, %v1759_v51  ;;  %v5103_v32 = vld [vmem:[#allocation2 + $0xa80] ss:$8 sps:$4 sm:$0xff]   ;;  %v5111_v35 = vld [vmem:[#allocation2 + $0xaa4] ss:$8 sps:$4 sm:$0xff]  }
 0x2e0   :  { %2673 = vmatmul.mubr.bf16.vlgmr.msra.gmra.mrb[12].mxu1 %v1811_v53  ;;  %v5168_v53 = vld [vmem:[#allocation2 + $0xbd4] ss:$8 sps:$4 sm:$0xff]   ;;  %v5109_v36 = vld [vmem:[#allocation2 + $0xaa0] ss:$8 sps:$4 sm:$0xff]  }
 0x2e1   :  { %2684 = vmatpush1.bf16.msra.mxu1 %v5031_v56  ;;  %2988 = vmatpush1.bf16.msra.mxu0 %v5157_v39  ;;  %v1756_v56 = vrot.slane %v5504_v28, %v1755_v50  ;;  %v5117_v39 = vld [vmem:[#allocation2 + $0xac4] ss:$8 sps:$4 sm:$0xff]   ;;  %v5169_v51 = vld [vmem:[#allocation2 + $0xbe0] ss:$8 sps:$4 sm:$0xff]  }
 0x2e2   :  { %2685 = vmatprep.subr.bf16.mxu1 %v5036_v57  ;;  %2989 = vmatprep.subr.bf16.mxu0 %v5162_v42  ;;  %v5075_v57 = vld [vmem:[#allocation2 + $0x9e4] ss:$8 sps:$4 sm:$0xff]   ;;  %v5115_v42 = vld [vmem:[#allocation2 + $0xac0] ss:$8 sps:$4 sm:$0xff]  }
 0x2e3   :  { %v5171_v50 = vld [vmem:[#allocation2 + $0xbe4] ss:$8 sps:$4 sm:$0xff]  }
 0x2e5   :  { %2686 = vmatpush1.bf16.msra.mxu1 %v5034_v60  ;;  %2990 = vmatpush1.bf16.msra.mxu0 %v5160_v46  ;;  %v5123_v46 = vld [vmem:[#allocation2 + $0xae4] ss:$8 sps:$4 sm:$0xff]  }
 0x2e6   :  { %2687 = vmatprep.subr.bf16.mxu1 %v5039_v62  ;;  %2991 = vmatprep.subr.bf16.mxu0 %v5165_v47  ;;  %v5121_v47 = vld [vmem:[#allocation2 + $0xae0] ss:$8 sps:$4 sm:$0xff]  }
 0x2e9   :  { %2688 = vmatpush1.bf16.msra.mxu1 %v5037_v3  ;;  %2992 = vmatpush1.bf16.msra.mxu0 %v5163_v52  ;;  %v5174_v52 = vld [vmem:[#allocation2 + $0xbf4] ss:$8 sps:$4 sm:$0xff]  }
 0x2ea   :  { %2689 = vmatprep.subr.bf16.mxu1 %v5042_v4  ;;  %2993 = vmatprep.subr.bf16.mxu0 %v5168_v53  ;;  %v5172_v53 = vld [vmem:[#allocation2 + $0xbf0] ss:$8 sps:$4 sm:$0xff]  }
 0x2ed   :  { %2690 = vmatpush1.bf16.msra.mxu1 %v5040_v54  ;;  %2994 = vmatpush1.bf16.msra.mxu0 %v5166_v59 }
 0x2ee   :  { %2691 = vmatprep.subr.bf16.mxu1 %v5045_v7  ;;  %v5076_v7 = vld [vmem:[#allocation2 + $0x9f0] ss:$8 sps:$4 sm:$0xff]   ;;  %2995 = vmatprep.subr.bf16.mxu0 %v5171_v50  ;;  %v5234_v50 = vld [vmem:[#allocation2 + $0xd34] ss:$8 sps:$4 sm:$0xff]  }
 0x2f1   :  { %2692 = vmatpush1.bf16.msra.mxu1 %v5043_v10  ;;  %2996 = vmatpush1.bf16.msra.mxu0 %v5169_v51  ;;  %v5232_v51 = vld [vmem:[#allocation2 + $0xd30] ss:$8 sps:$4 sm:$0xff]  }
 0x2f2   :  { %2693 = vmatprep.subr.bf16.mxu1 %v5048_v11  ;;  %2997 = vmatprep.subr.bf16.mxu0 %v5174_v52  ;;  %v5237_v52 = vld [vmem:[#allocation2 + $0xd44] ss:$8 sps:$4 sm:$0xff]  }
 0x2f5   :  { %2694 = vmatpush1.bf16.msra.mxu1 %v5046_v14  ;;  %v5079_v14 = vld [vmem:[#allocation2 + $0xa00] ss:$8 sps:$4 sm:$0xff]   ;;  %2998 = vmatpush1.bf16.msra.mxu0 %v5172_v53 }
 0x2f6   :  { %2695 = vmatprep.subr.bf16.mxu1 %v5051_v15  ;;  %v5084_v15 = vld [vmem:[#allocation2 + $0xa14] ss:$8 sps:$4 sm:$0xff]   ;;  %v5235_v53 = vld [vmem:[#allocation2 + $0xd40] ss:$8 sps:$4 sm:$0xff]  }
 0x2f9   :  { %2696 = vmatpush1.bf16.msra.mxu1 %v5049_v18  ;;  %v5085_v18 = vld [vmem:[#allocation2 + $0xa20] ss:$8 sps:$4 sm:$0xff]  }
 0x2fa   :  { %2697 = vmatprep.subr.bf16.mxu1 %v5054_v19  ;;  %v5090_v19 = vld [vmem:[#allocation2 + $0xa34] ss:$8 sps:$4 sm:$0xff]  }
 0x2fd   :  { %2698 = vmatpush1.bf16.msra.mxu1 %v5052_v22  ;;  %v5091_v22 = vld [vmem:[#allocation2 + $0xa40] ss:$8 sps:$4 sm:$0xff]  }
 0x2fe   :  { %2699 = vmatprep.subr.bf16.mxu1 %v5057_v23  ;;  %v5096_v23 = vld [vmem:[#allocation2 + $0xa54] ss:$8 sps:$4 sm:$0xff]  }
 0x301   :  { %2700 = vmatpush1.bf16.msra.mxu1 %v5055_v26  ;;  %v5102_v26 = vld [vmem:[#allocation2 + $0xa74] ss:$8 sps:$4 sm:$0xff]  }
 0x302   :  { %2701 = vmatprep.subr.bf16.mxu1 %v5060_v30  ;;  %v5100_v30 = vld [vmem:[#allocation2 + $0xa70] ss:$8 sps:$4 sm:$0xff]  }
 0x305   :  { %2702 = vmatpush1.bf16.msra.mxu1 %v5058_v33  ;;  %v5108_v33 = vld [vmem:[#allocation2 + $0xa94] ss:$8 sps:$4 sm:$0xff]  }
 0x306   :  { %2703 = vmatprep.subr.bf16.mxu1 %v5063_v34  ;;  %v5106_v34 = vld [vmem:[#allocation2 + $0xa90] ss:$8 sps:$4 sm:$0xff]  }
 0x309   :  { %2704 = vmatpush1.bf16.msra.mxu1 %v5061_v37  ;;  %v5114_v37 = vld [vmem:[#allocation2 + $0xab4] ss:$8 sps:$4 sm:$0xff]  }
 0x30a   :  { %2705 = vmatprep.subr.bf16.mxu1 %v5066_v38  ;;  %v5112_v38 = vld [vmem:[#allocation2 + $0xab0] ss:$8 sps:$4 sm:$0xff]  }
 0x30d   :  { %2706 = vmatpush1.bf16.msra.mxu1 %v5064_v44  ;;  %v5120_v44 = vld [vmem:[#allocation2 + $0xad4] ss:$8 sps:$4 sm:$0xff]  }
 0x30e   :  { %2707 = vmatprep.subr.bf16.mxu1 %v5069_v45  ;;  %v5118_v45 = vld [vmem:[#allocation2 + $0xad0] ss:$8 sps:$4 sm:$0xff]  }
 0x311   :  { %2708 = vmatpush1.bf16.msra.mxu1 %v5067_v48  ;;  %v5126_v48 = vld [vmem:[#allocation2 + $0xaf4] ss:$8 sps:$4 sm:$0xff]  }
 0x312   :  { %2709 = vmatprep.subr.bf16.mxu1 %v5072_v49  ;;  %v5124_v49 = vld [vmem:[#allocation2 + $0xaf0] ss:$8 sps:$4 sm:$0xff]  }
 0x315   :  { %v1491_v60 = vpop.f32.mrb[8].mxu1  ;;  %2710 = vmatpush1.bf16.msra.mxu1 %v5070_v55  ;;  %v5177_v55 = vld [vmem:[#allocation2 + $0xc04] ss:$8 sps:$4 sm:$0xff]  }
 0x316   :  { %v1781_v62 = vadd.f32 %v1756_v56, %v1491_v60  ;;  %v1493_v0 = vpop.f32.mrb[9].mxu1  ;;  %2711 = vmatprep.subr.bf16.mxu1 %v5075_v57  ;;  %3202 = vmatprep.subr.bf16.mxu0 %v5177_v55  ;;  %v5240_v55 = vld [vmem:[#allocation2 + $0xd54] ss:$8 sps:$4 sm:$0xff]  }
 0x317   :  { %v1782_v3 = vadd.f32 %v1760_v58, %v1493_v0  ;;  %v1495_v4 = vpop.f32.mrb[10].mxu1 }
 0x318   :  { %v1789_v5 = vadd.f32 %v1756_v56, %v1495_v4  ;;  %v1497_v6 = vpop.f32.mrb[11].mxu1  ;;  %v1797_v8 = vmax.f32 %v1781_v62, 0.0  ;;  %v1945_v56 = vld [vmem:[#allocation4 + $0xa] sm:$0x3] }
 0x319   :  { %v1790_v54 = vadd.f32 %v1760_v58, %v1497_v6  ;;  %2712 = vmatpush1.bf16.msra.mxu1 %v5073_v61  ;;  %v1798_v10 = vmax.f32 %v1782_v3, 0.0  ;;  %v1950_v57 = vrot.slane %v1945_v56, %v5484_v41  ;;  %v1954_v58 = vrot.slane %v1945_v56, %v5487_v43  ;;  %v5238_v56 = vld [vmem:[#allocation2 + $0xd50] ss:$8 sps:$4 sm:$0xff]  }
 0x31a   :  { %v1805_v28 = vmax.f32 %v1789_v5, 0.0  ;;  %2713 = vmatprep.subr.bf16.mxu1 %v5078_v2 }
 0x31b   :  { %v1806_v11 = vmax.f32 %v1790_v54, 0.0 }
 0x31c   :  { %v1813_v12 = vpack.c.bf16 %v1805_v28, %v1797_v8  ;;  %v5175_v28 = vld [vmem:[#allocation2 + $0xc00] ss:$8 sps:$4 sm:$0xff]  }
 0x31d   :  { %v1814_v13 = vpack.c.bf16 %v1806_v11, %v1798_v10  ;;  %2714 = vmatpush1.bf16.msra.mxu1 %v5076_v7  ;;  %v5178_v10 = vld [vmem:[#allocation2 + $0xc10] ss:$8 sps:$4 sm:$0xff]   ;;  %v5183_v11 = vld [vmem:[#allocation2 + $0xc24] ss:$8 sps:$4 sm:$0xff]  }
 0x31e   :  { %2726 = vmatprep.subr.bf16.mxu1 %v5081_v9  ;;  %v5180_v9 = vld [vmem:[#allocation2 + $0xc14] ss:$8 sps:$4 sm:$0xff]  }
 0x31f   :  { %2715 = vmatprep.mubr.bf16.mxu1 %v1814_v13  ;;  %v5186_v13 = vld [vmem:[#allocation2 + $0xc34] ss:$8 sps:$4 sm:$0xff]  }
 0x320   :  { %2716 = vmatmul.mubr.bf16.vlgmr.msra.gmra.mrb[12].mxu1 %v1813_v12  ;;  %v5181_v12 = vld [vmem:[#allocation2 + $0xc20] ss:$8 sps:$4 sm:$0xff]  }
 0x321   :  { %2727 = vmatpush1.bf16.msra.mxu1 %v5079_v14  ;;  %2758 = vmatprep.mubr.bf16.mxu1 %v5515_v1  ;;  %v5097_v1 = vld [vmem:[#allocation2 + $0xa60] ss:$8 sps:$4 sm:$0xff]   ;;  %v5184_v14 = vld [vmem:[#allocation2 + $0xc30] ss:$8 sps:$4 sm:$0xff]  }
 0x322   :  { %2728 = vmatprep.subr.bf16.mxu1 %v5084_v15  ;;  %v5189_v15 = vld [vmem:[#allocation2 + $0xc44] ss:$8 sps:$4 sm:$0xff]  }
 0x325   :  { %2729 = vmatpush1.bf16.msra.mxu1 %v5082_v16  ;;  %v5187_v16 = vld [vmem:[#allocation2 + $0xc40] ss:$8 sps:$4 sm:$0xff]  }
 0x326   :  { %2730 = vmatprep.subr.bf16.mxu1 %v5087_v17  ;;  %v5192_v17 = vld [vmem:[#allocation2 + $0xc54] ss:$8 sps:$4 sm:$0xff]  }
 0x329   :  { %2731 = vmatpush1.bf16.msra.mxu1 %v5085_v18  ;;  %v5190_v18 = vld [vmem:[#allocation2 + $0xc50] ss:$8 sps:$4 sm:$0xff]  }
 0x32a   :  { %2732 = vmatprep.subr.bf16.mxu1 %v5090_v19  ;;  %v5195_v19 = vld [vmem:[#allocation2 + $0xc64] ss:$8 sps:$4 sm:$0xff]  }
 0x32d   :  { %2733 = vmatpush1.bf16.msra.mxu1 %v5088_v20  ;;  %v5193_v20 = vld [vmem:[#allocation2 + $0xc60] ss:$8 sps:$4 sm:$0xff]  }
 0x32e   :  { %2734 = vmatprep.subr.bf16.mxu1 %v5093_v21  ;;  %v5198_v21 = vld [vmem:[#allocation2 + $0xc74] ss:$8 sps:$4 sm:$0xff]  }
 0x331   :  { %2735 = vmatpush1.bf16.msra.mxu1 %v5091_v22  ;;  %v5196_v22 = vld [vmem:[#allocation2 + $0xc70] ss:$8 sps:$4 sm:$0xff]  }
 0x332   :  { %2736 = vmatprep.subr.bf16.mxu1 %v5096_v23  ;;  %v5201_v23 = vld [vmem:[#allocation2 + $0xc84] ss:$8 sps:$4 sm:$0xff]  }
 0x335   :  { %2737 = vmatpush1.bf16.msra.mxu1 %v5094_v24  ;;  %v5199_v24 = vld [vmem:[#allocation2 + $0xc80] ss:$8 sps:$4 sm:$0xff]  }
 0x336   :  { %2738 = vmatprep.subr.bf16.mxu1 %v5099_v25  ;;  %v5204_v25 = vld [vmem:[#allocation2 + $0xc94] ss:$8 sps:$4 sm:$0xff]  }
 0x339   :  { %2739 = vmatpush1.bf16.msra.mxu1 %v5097_v1  ;;  %v5202_v1 = vld [vmem:[#allocation2 + $0xc90] ss:$8 sps:$4 sm:$0xff]  }
 0x33a   :  { %2740 = vmatprep.subr.bf16.mxu1 %v5102_v26  ;;  %v5207_v26 = vld [vmem:[#allocation2 + $0xca4] ss:$8 sps:$4 sm:$0xff]  }
 0x33d   :  { %2741 = vmatpush1.bf16.msra.mxu1 %v5100_v30  ;;  %v5205_v30 = vld [vmem:[#allocation2 + $0xca0] ss:$8 sps:$4 sm:$0xff]  }
 0x33e   :  { %2742 = vmatprep.subr.bf16.mxu1 %v5105_v31  ;;  %v5210_v31 = vld [vmem:[#allocation2 + $0xcb4] ss:$8 sps:$4 sm:$0xff]  }
 0x341   :  { %2743 = vmatpush1.bf16.msra.mxu1 %v5103_v32  ;;  %v5208_v32 = vld [vmem:[#allocation2 + $0xcb0] ss:$8 sps:$4 sm:$0xff]  }
 0x342   :  { %2744 = vmatprep.subr.bf16.mxu1 %v5108_v33  ;;  %v5213_v33 = vld [vmem:[#allocation2 + $0xcc4] ss:$8 sps:$4 sm:$0xff]  }
 0x345   :  { %2745 = vmatpush1.bf16.msra.mxu1 %v5106_v34  ;;  %v5211_v34 = vld [vmem:[#allocation2 + $0xcc0] ss:$8 sps:$4 sm:$0xff]  }
 0x346   :  { %2746 = vmatprep.subr.bf16.mxu1 %v5111_v35  ;;  %v5216_v35 = vld [vmem:[#allocation2 + $0xcd4] ss:$8 sps:$4 sm:$0xff]  }
 0x349   :  { %2747 = vmatpush1.bf16.msra.mxu1 %v5109_v36  ;;  %v5214_v36 = vld [vmem:[#allocation2 + $0xcd0] ss:$8 sps:$4 sm:$0xff]  }
 0x34a   :  { %2748 = vmatprep.subr.bf16.mxu1 %v5114_v37  ;;  %v5219_v37 = vld [vmem:[#allocation2 + $0xce4] ss:$8 sps:$4 sm:$0xff]  }
 0x34d   :  { %2749 = vmatpush1.bf16.msra.mxu1 %v5112_v38  ;;  %v5217_v38 = vld [vmem:[#allocation2 + $0xce0] ss:$8 sps:$4 sm:$0xff]  }
 0x34e   :  { %2750 = vmatprep.subr.bf16.mxu1 %v5117_v39  ;;  %v5222_v39 = vld [vmem:[#allocation2 + $0xcf4] ss:$8 sps:$4 sm:$0xff]  }
 0x351   :  { %2751 = vmatpush1.bf16.msra.mxu1 %v5115_v42  ;;  %v5220_v42 = vld [vmem:[#allocation2 + $0xcf0] ss:$8 sps:$4 sm:$0xff]  }
 0x352   :  { %2752 = vmatprep.subr.bf16.mxu1 %v5120_v44  ;;  %v5225_v44 = vld [vmem:[#allocation2 + $0xd04] ss:$8 sps:$4 sm:$0xff]  }
 0x355   :  { %2753 = vmatpush1.bf16.msra.mxu1 %v5118_v45  ;;  %v5223_v45 = vld [vmem:[#allocation2 + $0xd00] ss:$8 sps:$4 sm:$0xff]  }
 0x356   :  { %2754 = vmatprep.subr.bf16.mxu1 %v5123_v46  ;;  %v5228_v46 = vld [vmem:[#allocation2 + $0xd14] ss:$8 sps:$4 sm:$0xff]  }
 0x359   :  { %2755 = vmatpush1.bf16.msra.mxu1 %v5121_v47  ;;  %v5226_v47 = vld [vmem:[#allocation2 + $0xd10] ss:$8 sps:$4 sm:$0xff]  }
 0x35a   :  { %2756 = vmatprep.subr.bf16.mxu1 %v5126_v48  ;;  %v5231_v48 = vld [vmem:[#allocation2 + $0xd24] ss:$8 sps:$4 sm:$0xff]  }
 0x35d   :  { %2757 = vmatpush1.bf16.msra.mxu1 %v5124_v49  ;;  %v5229_v49 = vld [vmem:[#allocation2 + $0xd20] ss:$8 sps:$4 sm:$0xff]  }
 0x360   :  { %2759 = vmatmul.mubr.bf16.vlgmr.msra.gmra.mrb[12].mxu1 %v5513_v63 }
 0x433   :  { %v2760_v59 = vpop.f32.mrb[12].mxu1 }
 0x434   :  { %v4554_v60 = vadd.f32 %v2760_v59, %v1950_v57  ;;  %v2762_v61 = vpop.f32.mrb[13].mxu1  ;;  %v5246_v59 = vld [vmem:[#allocation2 + $0xd74] ss:$8 sps:$4 sm:$0xff]  }
 0x435   :  { %v4555_v62 = vadd.f32 %v2762_v61, %v1954_v58  ;;  %v2764_v63 = vpop.f32.mrb[14].mxu1  ;;  %v5249_v61 = vld [vmem:[#allocation2 + $0xd84] ss:$8 sps:$4 sm:$0xff]  }
 0x436   :  { %v4556_v0 = vadd.f32 %v2764_v63, %v1950_v57  ;;  %v2766_v2 = vpop.f32.mrb[15].mxu1  ;;  %v2769_v4 = vmax.f32 %v4554_v60, 0.0  ;;  %v5243_v57 = vld [vmem:[#allocation2 + $0xd64] ss:$8 sps:$4 sm:$0xff]   ;;  %v5244_v60 = vld [vmem:[#allocation2 + $0xd70] ss:$8 sps:$4 sm:$0xff]  }
 0x437   :  { %v4557_v3 = vadd.f32 %v2766_v2, %v1954_v58  ;;  %v2770_v6 = vmax.f32 %v4555_v62, 0.0  ;;  %v5241_v58 = vld [vmem:[#allocation2 + $0xd60] ss:$8 sps:$4 sm:$0xff]   ;;  %v5252_v63 = vld [vmem:[#allocation2 + $0xd94] ss:$8 sps:$4 sm:$0xff]  }
 0x438   :  { %v2771_v5 = vmax.f32 %v4556_v0, 0.0  ;;  %v5247_v62 = vld [vmem:[#allocation2 + $0xd80] ss:$8 sps:$4 sm:$0xff]   ;;  %v5250_v0 = vld [vmem:[#allocation2 + $0xd90] ss:$8 sps:$4 sm:$0xff]  }
 0x439   :  { %v2772_v54 = vmax.f32 %v4557_v3, 0.0  ;;  %v5255_v2 = vld [vmem:[#allocation2 + $0xda4] ss:$8 sps:$4 sm:$0xff]   ;;  %v5253_v3 = vld [vmem:[#allocation2 + $0xda0] ss:$8 sps:$4 sm:$0xff]  }
 0x43a   :  { %v5533_v7 = vpack.c.bf16 %v2771_v5, %v2769_v4  ;;  %v5258_v4 = vld [vmem:[#allocation2 + $0xdb4] ss:$8 sps:$4 sm:$0xff]   ;;  %v5256_v5 = vld [vmem:[#allocation2 + $0xdb0] ss:$8 sps:$4 sm:$0xff]  }
 0x43b   :  { %v2774_v8 = vpack.c.bf16 %v2772_v54, %v2770_v6  ;;  %v5261_v6 = vld [vmem:[#allocation2 + $0xdc4] ss:$8 sps:$4 sm:$0xff]   ;;  %v5259_v54 = vld [vmem:[#allocation2 + $0xdc0] ss:$8 sps:$4 sm:$0xff]  }
 0x43d   :  { %2999 = vmatprep.mubr.bf16.mxu0 %v2774_v8 }
 0x43e   :  { %3000 = vmatmul.mubr.bf16.vlgmr.msra.gmra.mrb[8].mxu0 %v5533_v7 }
 0x43f   :  { %3203 = vmatpush1.bf16.msra.mxu0 %v5175_v28  ;;  %3234 = vmatprep.mubr.bf16.mxu0 %v2774_v8  ;;  %v5262_v8 = vld [vmem:[#allocation2 + $0xdd0] ss:$8 sps:$4 sm:$0xff]   ;;  %v5267_v28 = vld [vmem:[#allocation2 + $0xde4] ss:$8 sps:$4 sm:$0xff]  }
 0x440   :  { %3204 = vmatprep.subr.bf16.mxu0 %v5180_v9  ;;  %v5265_v9 = vld [vmem:[#allocation2 + $0xde0] ss:$8 sps:$4 sm:$0xff]  }
 0x443   :  { %3205 = vmatpush1.bf16.msra.mxu0 %v5178_v10  ;;  %v5270_v10 = vld [vmem:[#allocation2 + $0xdf4] ss:$8 sps:$4 sm:$0xff]  }
 0x444   :  { %3206 = vmatprep.subr.bf16.mxu0 %v5183_v11  ;;  %v5268_v11 = vld [vmem:[#allocation2 + $0xdf0] ss:$8 sps:$4 sm:$0xff]  }
 0x447   :  { %3207 = vmatpush1.bf16.msra.mxu0 %v5181_v12  ;;  %v5273_v12 = vld [vmem:[#allocation2 + $0xe04] ss:$8 sps:$4 sm:$0xff]  }
 0x448   :  { %3208 = vmatprep.subr.bf16.mxu0 %v5186_v13  ;;  %v5319_v13 = vld [vmem:[#allocation2 + $0xf00] ss:$8 sps:$4 sm:$0xff]  }
 0x44b   :  { %3209 = vmatpush1.bf16.msra.mxu0 %v5184_v14  ;;  %v5321_v14 = vld [vmem:[#allocation2 + $0xf04] ss:$8 sps:$4 sm:$0xff]  }
 0x44c   :  { %3210 = vmatprep.subr.bf16.mxu0 %v5189_v15  ;;  %v5324_v15 = vld [vmem:[#allocation2 + $0xf14] ss:$8 sps:$4 sm:$0xff]   ;;  %3979 = vmatprep.subr.bf16.mxu1 %v5321_v14  ;;  %v5297_v14 = vld [vmem:[#allocation2 + $0xe84] ss:$8 sps:$4 sm:$0xff]  }
 0x44d   :  { %3980 = vmatpush1.bf16.msra.mxu1 %v5319_v13  ;;  %v5292_v13 = vld [vmem:[#allocation2 + $0xe70] ss:$8 sps:$4 sm:$0xff]  }
 0x44e   :  { %3981 = vmatprep.subr.bf16.mxu1 %v5324_v15  ;;  %v5295_v15 = vld [vmem:[#allocation2 + $0xe80] ss:$8 sps:$4 sm:$0xff]  }
 0x44f   :  { %3211 = vmatpush1.bf16.msra.mxu0 %v5187_v16  ;;  %v5322_v16 = vld [vmem:[#allocation2 + $0xf10] ss:$8 sps:$4 sm:$0xff]  }
 0x450   :  { %3212 = vmatprep.subr.bf16.mxu0 %v5192_v17  ;;  %v5327_v17 = vld [vmem:[#allocation2 + $0xf24] ss:$8 sps:$4 sm:$0xff]  }
 0x451   :  { %3982 = vmatpush1.bf16.msra.mxu1 %v5322_v16  ;;  %v5300_v16 = vld [vmem:[#allocation2 + $0xe94] ss:$8 sps:$4 sm:$0xff]  }
 0x452   :  { %3983 = vmatprep.subr.bf16.mxu1 %v5327_v17  ;;  %v5298_v17 = vld [vmem:[#allocation2 + $0xe90] ss:$8 sps:$4 sm:$0xff]  }
 0x453   :  { %3213 = vmatpush1.bf16.msra.mxu0 %v5190_v18  ;;  %v5325_v18 = vld [vmem:[#allocation2 + $0xf20] ss:$8 sps:$4 sm:$0xff]  }
 0x454   :  { %3214 = vmatprep.subr.bf16.mxu0 %v5195_v19  ;;  %v5330_v19 = vld [vmem:[#allocation2 + $0xf34] ss:$8 sps:$4 sm:$0xff]  }
 0x455   :  { %3984 = vmatpush1.bf16.msra.mxu1 %v5325_v18  ;;  %v5303_v18 = vld [vmem:[#allocation2 + $0xea4] ss:$8 sps:$4 sm:$0xff]  }
 0x456   :  { %3985 = vmatprep.subr.bf16.mxu1 %v5330_v19  ;;  %v5301_v19 = vld [vmem:[#allocation2 + $0xea0] ss:$8 sps:$4 sm:$0xff]  }
 0x457   :  { %3215 = vmatpush1.bf16.msra.mxu0 %v5193_v20  ;;  %v5328_v20 = vld [vmem:[#allocation2 + $0xf30] ss:$8 sps:$4 sm:$0xff]  }
 0x458   :  { %3216 = vmatprep.subr.bf16.mxu0 %v5198_v21  ;;  %v5333_v21 = vld [vmem:[#allocation2 + $0xf44] ss:$8 sps:$4 sm:$0xff]  }
 0x459   :  { %3986 = vmatpush1.bf16.msra.mxu1 %v5328_v20  ;;  %v5306_v20 = vld [vmem:[#allocation2 + $0xeb4] ss:$8 sps:$4 sm:$0xff]  }
 0x45a   :  { %3987 = vmatprep.subr.bf16.mxu1 %v5333_v21  ;;  %v5304_v21 = vld [vmem:[#allocation2 + $0xeb0] ss:$8 sps:$4 sm:$0xff]  }
 0x45b   :  { %3217 = vmatpush1.bf16.msra.mxu0 %v5196_v22  ;;  %v5331_v22 = vld [vmem:[#allocation2 + $0xf40] ss:$8 sps:$4 sm:$0xff]  }
 0x45c   :  { %3218 = vmatprep.subr.bf16.mxu0 %v5201_v23  ;;  %v5336_v23 = vld [vmem:[#allocation2 + $0xf54] ss:$8 sps:$4 sm:$0xff]  }
 0x45d   :  { %3988 = vmatpush1.bf16.msra.mxu1 %v5331_v22  ;;  %v5309_v22 = vld [vmem:[#allocation2 + $0xec4] ss:$8 sps:$4 sm:$0xff]  }
 0x45e   :  { %3989 = vmatprep.subr.bf16.mxu1 %v5336_v23  ;;  %v5307_v23 = vld [vmem:[#allocation2 + $0xec0] ss:$8 sps:$4 sm:$0xff]  }
 0x45f   :  { %3219 = vmatpush1.bf16.msra.mxu0 %v5199_v24  ;;  %v5334_v24 = vld [vmem:[#allocation2 + $0xf50] ss:$8 sps:$4 sm:$0xff]  }
 0x460   :  { %3220 = vmatprep.subr.bf16.mxu0 %v5204_v25  ;;  %v5339_v25 = vld [vmem:[#allocation2 + $0xf64] ss:$8 sps:$4 sm:$0xff]  }
 0x461   :  { %3990 = vmatpush1.bf16.msra.mxu1 %v5334_v24  ;;  %v5312_v24 = vld [vmem:[#allocation2 + $0xed4] ss:$8 sps:$4 sm:$0xff]  }
 0x462   :  { %3991 = vmatprep.subr.bf16.mxu1 %v5339_v25  ;;  %v5310_v25 = vld [vmem:[#allocation2 + $0xed0] ss:$8 sps:$4 sm:$0xff]  }
 0x463   :  { %3221 = vmatpush1.bf16.msra.mxu0 %v5202_v1  ;;  %v5337_v1 = vld [vmem:[#allocation2 + $0xf60] ss:$8 sps:$4 sm:$0xff]  }
 0x464   :  { %3222 = vmatprep.subr.bf16.mxu0 %v5207_v26  ;;  %v5342_v26 = vld [vmem:[#allocation2 + $0xf74] ss:$8 sps:$4 sm:$0xff]  }
 0x465   :  { %3992 = vmatpush1.bf16.msra.mxu1 %v5337_v1 }
 0x466   :  { %3993 = vmatprep.subr.bf16.mxu1 %v5342_v26  ;;  %v5315_v26 = vld [vmem:[#allocation2 + $0xee4] ss:$8 sps:$4 sm:$0xff]  }
 0x467   :  { %3223 = vmatpush1.bf16.msra.mxu0 %v5205_v30  ;;  %v5340_v30 = vld [vmem:[#allocation2 + $0xf70] ss:$8 sps:$4 sm:$0xff]  }
 0x468   :  { %3224 = vmatprep.subr.bf16.mxu0 %v5210_v31  ;;  %v5345_v31 = vld [vmem:[#allocation2 + $0xf84] ss:$8 sps:$4 sm:$0xff]  }
 0x469   :  { %3994 = vmatpush1.bf16.msra.mxu1 %v5340_v30 }
 0x46a   :  { %3995 = vmatprep.subr.bf16.mxu1 %v5345_v31 }
 0x46b   :  { %3225 = vmatpush1.bf16.msra.mxu0 %v5208_v32  ;;  %v5343_v32 = vld [vmem:[#allocation2 + $0xf80] ss:$8 sps:$4 sm:$0xff]  }
 0x46c   :  { %3226 = vmatprep.subr.bf16.mxu0 %v5213_v33  ;;  %v5348_v33 = vld [vmem:[#allocation2 + $0xf94] ss:$8 sps:$4 sm:$0xff]  }
 0x46d   :  { %3996 = vmatpush1.bf16.msra.mxu1 %v5343_v32  ;;  %v5313_v32 = vld [vmem:[#allocation2 + $0xee0] ss:$8 sps:$4 sm:$0xff]  }
 0x46e   :  { %3997 = vmatprep.subr.bf16.mxu1 %v5348_v33 }
 0x46f   :  { %3227 = vmatpush1.bf16.msra.mxu0 %v5211_v34  ;;  %v5346_v34 = vld [vmem:[#allocation2 + $0xf90] ss:$8 sps:$4 sm:$0xff]  }
 0x470   :  { %3228 = vmatprep.subr.bf16.mxu0 %v5216_v35  ;;  %v5351_v35 = vld [vmem:[#allocation2 + $0xfa4] ss:$8 sps:$4 sm:$0xff]  }
 0x471   :  { %3998 = vmatpush1.bf16.msra.mxu1 %v5346_v34 }
 0x472   :  { %3999 = vmatprep.subr.bf16.mxu1 %v5351_v35  ;;  %v5318_v35 = vld [vmem:[#allocation2 + $0xef4] ss:$8 sps:$4 sm:$0xff]  }
 0x473   :  { %3229 = vmatpush1.bf16.msra.mxu0 %v5214_v36  ;;  %v5349_v36 = vld [vmem:[#allocation2 + $0xfa0] ss:$8 sps:$4 sm:$0xff]  }
 0x474   :  { %3230 = vmatprep.subr.bf16.mxu0 %v5219_v37  ;;  %v5354_v37 = vld [vmem:[#allocation2 + $0xfb4] ss:$8 sps:$4 sm:$0xff]  }
 0x475   :  { %4000 = vmatpush1.bf16.msra.mxu1 %v5349_v36 }
 0x476   :  { %4001 = vmatprep.subr.bf16.mxu1 %v5354_v37 }
 0x477   :  { %3231 = vmatpush1.bf16.msra.mxu0 %v5217_v38  ;;  %v5352_v38 = vld [vmem:[#allocation2 + $0xfb0] ss:$8 sps:$4 sm:$0xff]  }
 0x478   :  { %3232 = vmatprep.subr.bf16.mxu0 %v5222_v39  ;;  %v5357_v39 = vld [vmem:[#allocation2 + $0xfc4] ss:$8 sps:$4 sm:$0xff]  }
 0x479   :  { %4002 = vmatpush1.bf16.msra.mxu1 %v5352_v38 }
 0x47a   :  { %4003 = vmatprep.subr.bf16.mxu1 %v5357_v39 }
 0x47b   :  { %3233 = vmatpush1.bf16.msra.mxu0 %v5220_v42  ;;  %v5537_v42 = vld [vmem:[#allocation4 + $0xc] sm:$0xf] }
 0x47c   :  { %3683 = vmatprep.subr.bf16.mxu0 %v5225_v44  ;;  %v5355_v44 = vld [vmem:[#allocation2 + $0xfc0] ss:$8 sps:$4 sm:$0xff]   ;;  %v3258_v1 = vrot.slane %v5537_v42, %v1747_v27  ;;  %v3262_v30 = vrot.slane %v5537_v42, %v1751_v29 }
 0x47d   :  { %4004 = vmatpush1.bf16.msra.mxu1 %v5355_v44 }
 0x47e   :  { %3235 = vmatmul.mubr.bf16.vlgmr.msra.gmra.mrb[12].mxu0 %v5533_v7  ;;  %v5264_v7 = vld [vmem:[#allocation2 + $0xdd4] ss:$8 sps:$4 sm:$0xff]  }
 0x47f   :  { %3684 = vmatpush1.bf16.msra.mxu0 %v5223_v45  ;;  %v5360_v45 = vld [vmem:[#allocation2 + $0xfd4] ss:$8 sps:$4 sm:$0xff]  }
 0x480   :  { %3685 = vmatprep.subr.bf16.mxu0 %v5228_v46  ;;  %v3250_v46 = vrot.slane %v5537_v42, %v5484_v41  ;;  %4005 = vmatprep.subr.bf16.mxu1 %v5360_v45  ;;  %v5316_v45 = vld [vmem:[#allocation2 + $0xef0] ss:$8 sps:$4 sm:$0xff]  }
 0x483   :  { %3686 = vmatpush1.bf16.msra.mxu0 %v5226_v47  ;;  %v3254_v47 = vrot.slane %v5537_v42, %v5487_v43 }
 0x484   :  { %3687 = vmatprep.subr.bf16.mxu0 %v5231_v48  ;;  %v5358_v48 = vld [vmem:[#allocation2 + $0xfd0] ss:$8 sps:$4 sm:$0xff]  }
 0x485   :  { %4006 = vmatpush1.bf16.msra.mxu1 %v5358_v48  ;;  %v5363_v48 = vld [vmem:[#allocation2 + $0xfe4] ss:$8 sps:$4 sm:$0xff]  }
 0x486   :  { %4007 = vmatprep.subr.bf16.mxu1 %v5363_v48 }
 0x487   :  { %3688 = vmatpush1.bf16.msra.mxu0 %v5229_v49 }
 0x488   :  { %3689 = vmatprep.subr.bf16.mxu0 %v5234_v50 }
 0x48b   :  { %3690 = vmatpush1.bf16.msra.mxu0 %v5232_v51 }
 0x48c   :  { %3691 = vmatprep.subr.bf16.mxu0 %v5237_v52 }
 0x48f   :  { %3692 = vmatpush1.bf16.msra.mxu0 %v5235_v53 }
 0x490   :  { %3693 = vmatprep.subr.bf16.mxu0 %v5240_v55 }
 0x493   :  { %3694 = vmatpush1.bf16.msra.mxu0 %v5238_v56 }
 0x494   :  { %3695 = vmatprep.subr.bf16.mxu0 %v5243_v57 }
 0x497   :  { %3696 = vmatpush1.bf16.msra.mxu0 %v5241_v58 }
 0x498   :  { %3697 = vmatprep.subr.bf16.mxu0 %v5246_v59 }
 0x49b   :  { %3698 = vmatpush1.bf16.msra.mxu0 %v5244_v60 }
 0x49c   :  { %3699 = vmatprep.subr.bf16.mxu0 %v5249_v61 }
 0x49f   :  { %3700 = vmatpush1.bf16.msra.mxu0 %v5247_v62 }
 0x4a0   :  { %3701 = vmatprep.subr.bf16.mxu0 %v5252_v63 }
 0x4a3   :  { %3702 = vmatpush1.bf16.msra.mxu0 %v5250_v0  ;;  %v5271_v0 = vld [vmem:[#allocation2 + $0xe00] ss:$8 sps:$4 sm:$0xff]  }
 0x4a4   :  { %3703 = vmatprep.subr.bf16.mxu0 %v5255_v2  ;;  %v5276_v2 = vld [vmem:[#allocation2 + $0xe14] ss:$8 sps:$4 sm:$0xff]  }
 0x4a7   :  { %3704 = vmatpush1.bf16.msra.mxu0 %v5253_v3  ;;  %v5274_v3 = vld [vmem:[#allocation2 + $0xe10] ss:$8 sps:$4 sm:$0xff]  }
 0x4a8   :  { %3705 = vmatprep.subr.bf16.mxu0 %v5258_v4  ;;  %v5279_v4 = vld [vmem:[#allocation2 + $0xe24] ss:$8 sps:$4 sm:$0xff]  }
 0x4ab   :  { %3706 = vmatpush1.bf16.msra.mxu0 %v5256_v5  ;;  %v5277_v5 = vld [vmem:[#allocation2 + $0xe20] ss:$8 sps:$4 sm:$0xff]  }
 0x4ac   :  { %3707 = vmatprep.subr.bf16.mxu0 %v5261_v6  ;;  %v5282_v6 = vld [vmem:[#allocation2 + $0xe34] ss:$8 sps:$4 sm:$0xff]  }
 0x4af   :  { %3708 = vmatpush1.bf16.msra.mxu0 %v5259_v54  ;;  %v5280_v54 = vld [vmem:[#allocation2 + $0xe30] ss:$8 sps:$4 sm:$0xff]  }
 0x4b0   :  { %3709 = vmatprep.subr.bf16.mxu0 %v5264_v7  ;;  %v5285_v7 = vld [vmem:[#allocation2 + $0xe44] ss:$8 sps:$4 sm:$0xff]  }
 0x4b3   :  { %3710 = vmatpush1.bf16.msra.mxu0 %v5262_v8  ;;  %v5283_v8 = vld [vmem:[#allocation2 + $0xe40] ss:$8 sps:$4 sm:$0xff]  }
 0x4b4   :  { %3711 = vmatprep.subr.bf16.mxu0 %v5267_v28  ;;  %v5288_v28 = vld [vmem:[#allocation2 + $0xe54] ss:$8 sps:$4 sm:$0xff]  }
 0x4b7   :  { %3712 = vmatpush1.bf16.msra.mxu0 %v5265_v9  ;;  %v5286_v9 = vld [vmem:[#allocation2 + $0xe50] ss:$8 sps:$4 sm:$0xff]  }
 0x4b8   :  { %3713 = vmatprep.subr.bf16.mxu0 %v5270_v10  ;;  %v5291_v10 = vld [vmem:[#allocation2 + $0xe64] ss:$8 sps:$4 sm:$0xff]  }
 0x4bb   :  { %3714 = vmatpush1.bf16.msra.mxu0 %v5268_v11  ;;  %v5289_v11 = vld [vmem:[#allocation2 + $0xe60] ss:$8 sps:$4 sm:$0xff]  }
 0x4bc   :  { %3726 = vmatprep.subr.bf16.mxu0 %v5273_v12  ;;  %v5294_v12 = vld [vmem:[#allocation2 + $0xe74] ss:$8 sps:$4 sm:$0xff]  }
 0x511   :  { %v3001_v49 = vpop.f32.mrb[8].mxu0 }
 0x512   :  { %v3267_v50 = vadd.f32 %v3250_v46, %v3001_v49  ;;  %v3003_v51 = vpop.f32.mrb[9].mxu0  ;;  %v5361_v49 = vld [vmem:[#allocation2 + $0xfe0] ss:$8 sps:$4 sm:$0xff]  }
 0x513   :  { %v3268_v52 = vadd.f32 %v3254_v47, %v3003_v51  ;;  %v3005_v53 = vpop.f32.mrb[10].mxu0  ;;  %4008 = vmatpush1.bf16.msra.mxu1 %v5361_v49  ;;  %v5364_v51 = vld [vmem:[#allocation2 + $0xff0] ss:$8 sps:$4 sm:$0xff]  }
 0x514   :  { %v3271_v55 = vadd.f32 %v3250_v46, %v3005_v53  ;;  %v3007_v56 = vpop.f32.mrb[11].mxu0  ;;  %v3275_v58 = vmax.f32 %v3267_v50, 0.0  ;;  %v5366_v50 = vld [vmem:[#allocation2 + $0xff4] ss:$8 sps:$4 sm:$0xff]  }
 0x515   :  { %v3272_v57 = vadd.f32 %v3254_v47, %v3007_v56  ;;  %v3276_v60 = vmax.f32 %v3268_v52, 0.0  ;;  %4009 = vmatprep.subr.bf16.mxu1 %v5366_v50  ;;  %v3351_v52 = vld [vmem:[#allocation4 + $0x10] sm:$0x3] }
 0x516   :  { %v3279_v59 = vmax.f32 %v3271_v55, 0.0  ;;  %v3356_v53 = vrot.slane %v3351_v52, %v5484_v41  ;;  %v3360_v55 = vrot.slane %v3351_v52, %v5487_v43 }
 0x517   :  { %v3280_v61 = vmax.f32 %v3272_v57, 0.0  ;;  %4010 = vmatpush1.bf16.msra.mxu1 %v5364_v51 }
 0x518   :  { %v3283_v62 = vpack.c.bf16 %v3279_v59, %v3275_v58 }
 0x519   :  { %v3284_v63 = vpack.c.bf16 %v3280_v61, %v3276_v60 }
 0x51b   :  { %3715 = vmatprep.mubr.bf16.mxu0 %v3284_v63 }
 0x51c   :  { %3716 = vmatmul.mubr.bf16.vlgmr.msra.gmra.mrb[16].mxu0 %v3283_v62 }
 0x51d   :  { %3727 = vmatpush1.bf16.msra.mxu0 %v5271_v0 }
 0x51e   :  { %3728 = vmatprep.subr.bf16.mxu0 %v5276_v2 }
 0x521   :  { %3729 = vmatpush1.bf16.msra.mxu0 %v5274_v3 }
 0x522   :  { %3730 = vmatprep.subr.bf16.mxu0 %v5279_v4 }
 0x525   :  { %3731 = vmatpush1.bf16.msra.mxu0 %v5277_v5 }
 0x526   :  { %3732 = vmatprep.subr.bf16.mxu0 %v5282_v6 }
 0x529   :  { %3733 = vmatpush1.bf16.msra.mxu0 %v5280_v54  ;;  %v3807_v54 = vld [vmem:[#allocation4 + $0x12] sm:$0x3] }
 0x52a   :  { %3734 = vmatprep.subr.bf16.mxu0 %v5285_v7  ;;  %v3812_v7 = vrot.slane %v3807_v54, %v5484_v41 }
 0x52d   :  { %3735 = vmatpush1.bf16.msra.mxu0 %v5283_v8  ;;  %v3816_v8 = vrot.slane %v3807_v54, %v5487_v43 }
 0x52e   :  { %3736 = vmatprep.subr.bf16.mxu0 %v5288_v28 }
 0x531   :  { %3737 = vmatpush1.bf16.msra.mxu0 %v5286_v9 }
 0x532   :  { %3738 = vmatprep.subr.bf16.mxu0 %v5291_v10 }
 0x535   :  { %3739 = vmatpush1.bf16.msra.mxu0 %v5289_v11 }
 0x536   :  { %3740 = vmatprep.subr.bf16.mxu0 %v5294_v12 }
 0x539   :  { %3741 = vmatpush1.bf16.msra.mxu0 %v5292_v13 }
 0x53a   :  { %3742 = vmatprep.subr.bf16.mxu0 %v5297_v14 }
 0x53d   :  { %3743 = vmatpush1.bf16.msra.mxu0 %v5295_v15 }
 0x53e   :  { %3744 = vmatprep.subr.bf16.mxu0 %v5300_v16 }
 0x541   :  { %3745 = vmatpush1.bf16.msra.mxu0 %v5298_v17 }
 0x542   :  { %3746 = vmatprep.subr.bf16.mxu0 %v5303_v18 }
 0x545   :  { %3747 = vmatpush1.bf16.msra.mxu0 %v5301_v19 }
 0x546   :  { %3748 = vmatprep.subr.bf16.mxu0 %v5306_v20 }
 0x549   :  { %3749 = vmatpush1.bf16.msra.mxu0 %v5304_v21 }
 0x54a   :  { %3750 = vmatprep.subr.bf16.mxu0 %v5309_v22 }
 0x54d   :  { %3751 = vmatpush1.bf16.msra.mxu0 %v5307_v23 }
 0x54e   :  { %3752 = vmatprep.subr.bf16.mxu0 %v5312_v24 }
 0x551   :  { %v3236_v31 = vpop.f32.mrb[12].mxu0  ;;  %3753 = vmatpush1.bf16.msra.mxu0 %v5310_v25 }
 0x552   :  { %v3269_v33 = vadd.f32 %v3258_v1, %v3236_v31  ;;  %v3238_v34 = vpop.f32.mrb[13].mxu0  ;;  %3754 = vmatprep.subr.bf16.mxu0 %v5315_v26 }
 0x553   :  { %v3270_v36 = vadd.f32 %v3262_v30, %v3238_v34  ;;  %v3240_v37 = vpop.f32.mrb[14].mxu0 }
 0x554   :  { %v3273_v38 = vadd.f32 %v3258_v1, %v3240_v37  ;;  %v3242_v39 = vpop.f32.mrb[15].mxu0  ;;  %v3277_v27 = vmax.f32 %v3269_v33, 0.0 }
 0x555   :  { %v3274_v44 = vadd.f32 %v3262_v30, %v3242_v39  ;;  %3755 = vmatpush1.bf16.msra.mxu0 %v5313_v32  ;;  %v3278_v40 = vmax.f32 %v3270_v36, 0.0 }
 0x556   :  { %v3281_v46 = vmax.f32 %v3273_v38, 0.0  ;;  %3756 = vmatprep.subr.bf16.mxu0 %v5318_v35 }
 0x557   :  { %v3282_v47 = vmax.f32 %v3274_v44, 0.0 }
 0x558   :  { %v3285_v29 = vpack.c.bf16 %v3281_v46, %v3277_v27 }
 0x559   :  { %v3286_v42 = vpack.c.bf16 %v3282_v47, %v3278_v40  ;;  %3757 = vmatpush1.bf16.msra.mxu0 %v5316_v45 }
 0x55b   :  { %3758 = vmatprep.mubr.bf16.mxu0 %v3286_v42 }
 0x55c   :  { %3759 = vmatmul.mubr.bf16.vlgmr.msra.gmra.mrb[16].mxu0 %v3285_v29 }
 0x62f   :  { %v3760_v56 = vpop.f32.mrb[16].mxu0 }
 0x630   :  { %v4558_v57 = vadd.f32 %v3760_v56, %v3356_v53  ;;  %v3762_v58 = vpop.f32.mrb[17].mxu0 }
 0x631   :  { %v4559_v59 = vadd.f32 %v3762_v58, %v3360_v55  ;;  %v3764_v60 = vpop.f32.mrb[18].mxu0 }
 0x632   :  { %v4560_v61 = vadd.f32 %v3764_v60, %v3356_v53  ;;  %v3766_v62 = vpop.f32.mrb[19].mxu0  ;;  %v3769_v0 = vmax.f32 %v4558_v57, 0.0 }
 0x633   :  { %v4561_v63 = vadd.f32 %v3766_v62, %v3360_v55  ;;  %v3770_v3 = vmax.f32 %v4559_v59, 0.0 }
 0x634   :  { %v3771_v2 = vmax.f32 %v4560_v61, 0.0 }
 0x635   :  { %v3772_v4 = vmax.f32 %v4561_v63, 0.0 }
 0x636   :  { %v3773_v5 = vpack.c.bf16 %v3771_v2, %v3769_v0 }
 0x637   :  { %v3774_v6 = vpack.c.bf16 %v3772_v4, %v3770_v3 }
 0x639   :  { %4011 = vmatprep.mubr.bf16.mxu1 %v3774_v6 }
 0x63a   :  { %4012 = vmatmul.mubr.bf16.vlgmr.msra.gmra.mrb[16].mxu1 %v3773_v5 }
 0x70d   :  { %v4013_v28 = vpop.f32.mrb[16].mxu1 }
 0x70e   :  { %v4014_v9 = vadd.f32 %v4013_v28, %v3812_v7  ;;  %v4015_v10 = vpop.f32.mrb[17].mxu1 }
 0x70f   :  { %v4016_v11 = vadd.f32 %v4015_v10, %v3816_v8  ;;  %v4017_v12 = vpop.f32.mrb[18].mxu1 }
 0x710   :  { %4022 = vst [vmem:[%s5568_s3] sm:$0xff] %v4014_v9  ;;  %v4018_v13 = vadd.f32 %v4017_v12, %v3812_v7  ;;  %v4019_v14 = vpop.f32.mrb[19].mxu1 }
 0x711   :  { %4023 = vst [vmem:[%s5568_s3 + $0x8] sm:$0xff] %v4016_v11  ;;  %v4020_v15 = vadd.f32 %v4019_v14, %v3816_v8 }
 0x712   :  { %4024 = vst [vmem:[%s5568_s3 + $0x10] sm:$0xff] %v4018_v13 }
 0x713   :  { %4025 = vst [vmem:[%s5568_s3 + $0x18] sm:$0xff] %v4020_v15 }
 0x714   :  { %4030 = vsyncpa [#allocation3], 1 }
 0x715   :  { %4031 = vsyncpa [#allocation5], 1 }

</bundles_post_ra>
